<compile_context>
chip_gen: v6e
topology: v6e:2x2x1
jax: 0.10.0
libtpu: 0.0.40
codegen_flags: <defaults>
</compile_context>

<pallas_src>
import functools

import jax
import jax.numpy as jnp
from jax.experimental import pallas as pl
from jax.experimental.pallas import tpu as pltpu


def _round_up(x, m):
    return (x + m - 1) // m * m


# --------------------------------------------------------------------------- #
# Pallas kernel: fused complex conv (as one matmul) + stable complex sigmoid +
# complex gated multiply with every input part.  Gridded over batch.
# --------------------------------------------------------------------------- #
def _gated_kernel(p_ref, w_ref, *rest, in_channels, cpad):
    n_parts = len(in_channels)
    part_refs = rest[:2 * n_parts]           # pr_0, pi_0, pr_1, pi_1, ...
    out_refs = rest[2 * n_parts:]            # or_0, oi_0, or_1, oi_1, ...

    # fused complex conv: (2*cpad, K2pad) @ (K2pad, DHW) -> (2*cpad, DHW), f32
    acc = jnp.dot(w_ref[...], p_ref[0], preferred_element_type=jnp.float32)
    a = acc[:cpad, :]                        # Re(conv)
    b = acc[cpad:, :]                        # Im(conv)

    # numerically-stable complex sigmoid 1/(1+exp(-(a+ib)))
    g = jnp.exp(-jnp.abs(a))                 # exp(-|a|) <= 1, never overflows
    cb = jnp.cos(b)
    sb = jnp.sin(b)
    den = 1.0 + 2.0 * g * cb + g * g
    inv = pl.reciprocal(den, approx=True)
    sr = jnp.where(a >= 0.0, 1.0 + g * cb, g * (g + cb)) * inv
    si = (g * sb) * inv

    # complex gating: result.parts[l] = sigmoid(conv)[..., split:split+c] * x.parts[l]
    split = 0
    for l in range(n_parts):
        c = in_channels[l]
        fr = sr[split:split + c, :][None, :, :]   # (1, c, DHW) broadcast over 2l+1
        fi = si[split:split + c, :][None, :, :]
        pr = part_refs[2 * l][0]                  # (2l+1, c, DHW)
        pi = part_refs[2 * l + 1][0]
        out_refs[2 * l][0] = fr * pr - fi * pi
        out_refs[2 * l + 1][0] = fr * pi + fi * pr
        split += c


# --------------------------------------------------------------------------- #
# Wrapper (glue: merge channels, im2col, weight prepack, layout transposes)
# --------------------------------------------------------------------------- #
def se3_gated_nonlinearity(parts, conv_kernel, in_channels):
    B, D, H, W = parts[0].shape[:4]
    cout, cin = conv_kernel.shape[0], conv_kernel.shape[1]
    K = conv_kernel.shape[-1]
    pad = K // 2                       # padding='same' for odd kernel, stride 1
    DHW = D * H * W
    Kc = K ** 3 * cin
    K2 = 2 * Kc
    K2pad = _round_up(K2, 128)         # MXU-aligned contraction dim
    cpad = _round_up(cout, 8)          # sublane-aligned real/imag row blocks

    # ---- im2col patch matrix (B, K^3*cin, DHW), tap-major / cin-minor rows ----
    # TODO(synk): for production volumes (e.g. 64^3, v7x's 64 MiB VMEM) extract
    # patches in-kernel over a spatially tiled grid with a `pad` halo instead of
    # materializing the K^3-duplicated patch matrix in HBM.
    merged = jnp.concatenate([p.reshape(B, D, H, W, -1) for p in parts], axis=-1)
    mp = jnp.pad(merged, ((0, 0), (pad, pad), (pad, pad), (pad, pad), (0, 0)))
    slabs = []
    for kz in range(K):
        for ky in range(K):
            for kx in range(K):
                s = mp[:, kz:kz + D, ky:ky + H, kx:kx + W, :]          # (B,D,H,W,cin)
                slabs.append(jnp.transpose(s, (0, 4, 1, 2, 3)).reshape(B, cin, DHW))
    patches = jnp.concatenate(slabs, axis=1)                            # (B, Kc, DHW) complex
    p_full = jnp.zeros((B, K2pad, DHW), jnp.float32)
    p_full = p_full.at[:, :Kc, :].set(jnp.real(patches).astype(jnp.float32))
    p_full = p_full.at[:, Kc:K2, :].set(jnp.imag(patches).astype(jnp.float32))
    p_full = p_full.astype(jnp.bfloat16)

    # ---- fused block weight [[Wr, -Wi], [Wi, Wr]], padded + bf16 ----
    wk = jnp.transpose(conv_kernel, (0, 2, 3, 4, 1)).reshape(cout, Kc)  # tap-major, cin-minor
    wr = jnp.real(wk).astype(jnp.float32)
    wi = jnp.imag(wk).astype(jnp.float32)
    w_full = jnp.zeros((2 * cpad, K2pad), jnp.float32)
    w_full = w_full.at[:cout, :Kc].set(wr).at[:cout, Kc:K2].set(-wi)
    w_full = w_full.at[cpad:cpad + cout, :Kc].set(wi).at[cpad:cpad + cout, Kc:K2].set(wr)
    w_full = w_full.astype(jnp.bfloat16)

    # ---- parts in lane-dense (B, 2l+1, C_l, DHW) layout ----
    part_inputs, part_specs, out_specs, out_shapes = [], [], [], []
    for l, p in enumerate(parts):
        m, c = 2 * l + 1, in_channels[l]
        pt = jnp.transpose(p, (0, 4, 5, 1, 2, 3)).reshape(B, m, c, DHW)
        part_inputs += [jnp.real(pt).astype(jnp.float32),
                        jnp.imag(pt).astype(jnp.float32)]
        spec = pl.BlockSpec((1, m, c, DHW), lambda b: (b, 0, 0, 0))
        part_specs += [spec, spec]
        out_specs += [spec, spec]
        out_shapes += [jax.ShapeDtypeStruct((B, m, c, DHW), jnp.float32)] * 2

    kernel_fn = functools.partial(_gated_kernel,
                                  in_channels=tuple(in_channels), cpad=cpad)

    in_specs = ([pl.BlockSpec((1, K2pad, DHW), lambda b: (b, 0, 0)),
                 # constant index map -> tiny weight stays resident across grid
                 pl.BlockSpec((2 * cpad, K2pad), lambda b: (0, 0))]
                + part_specs)

    outs = pl.pallas_call(
        kernel_fn,
        out_shape=tuple(out_shapes),
        grid_spec=pltpu.PrefetchScalarGridSpec(
            num_scalar_prefetch=0,
            grid=(B,),
            in_specs=in_specs,
            out_specs=tuple(out_specs)),
        compiler_params=pltpu.CompilerParams(
            dimension_semantics=("parallel",)),
    )(p_full, w_full, *part_inputs)

    results = []
    for l in range(len(parts)):
        m, c = 2 * l + 1, in_channels[l]
        orr = outs[2 * l].reshape(B, m, c, D, H, W)
        oii = outs[2 * l + 1].reshape(B, m, c, D, H, W)
        comp = (orr + 1j * oii).astype(jnp.complex64)
        results.append(jnp.transpose(comp, (0, 3, 4, 5, 1, 2)))       # (B,D,H,W,2l+1,c)
    return results


# --------------------------------------------------------------------------- #
# Deterministic parameter construction (mirrors SE3Conv.__init__/get_kernel for
# out_channels = [sum(in_channels)], i.e. the single l=0 output used here).
# --------------------------------------------------------------------------- #
def build_conv_kernel(key, in_channels, out_channels_total, kernel_size, n_radius):
    L = len(in_channels)
    K = kernel_size
    blocks = []
    for l1, c_l1 in enumerate(in_channels):
        key, k1, k2, k3, k4 = jax.random.split(key, 5)
        w = (jax.random.normal(k1, (out_channels_total, 1, c_l1, L * n_radius))
             + 1j * jax.random.normal(k2, (out_channels_total, 1, c_l1, L * n_radius))
             ).astype(jnp.complex64)
        # TODO(synk): get_CFint_matrix (SE(3) steerable basis) is not provided;
        # use a deterministic synthetic Fint with the processed shape
        # (2l+1, 1, 2l1+1, L*n_radius, K^3) for l = 0.
        m1 = 2 * l1 + 1
        fint = 0.005 * (jax.random.normal(k3, (1, 1, m1, L * n_radius, K ** 3))
                        + 1j * jax.random.normal(k4, (1, 1, m1, L * n_radius, K ** 3))
                        ).astype(jnp.complex64)
        kb = jnp.matmul(w, fint)                              # (1, out_c, m1, c_l1, K^3)
        kb = kb.reshape(out_channels_total, m1 * c_l1, K, K, K)
        blocks.append(kb)
    return jnp.concatenate(blocks, axis=1)                    # (out_c, Cin_total, K,K,K)


# --------------------------------------------------------------------------- #
# Pure-JAX reference (same math, complex arithmetic) for a sanity check.
# --------------------------------------------------------------------------- #
def reference_forward(parts, conv_kernel, in_channels):
    B, D, H, W = parts[0].shape[:4]
    K = conv_kernel.shape[-1]
    cout = conv_kernel.shape[0]
    pad = K // 2
    merged = jnp.concatenate([p.reshape(B, D, H, W, -1) for p in parts], axis=-1)
    mp = jnp.pad(merged, ((0, 0), (pad, pad), (pad, pad), (pad, pad), (0, 0)))
    out = jnp.zeros((B, D, H, W, cout), jnp.complex64)
    for kz in range(K):
        for ky in range(K):
            for kx in range(K):
                out = out + jnp.einsum(
                    'bzyxi,oi->bzyxo',
                    mp[:, kz:kz + D, ky:ky + H, kx:kx + W, :],
                    conv_kernel[:, :, kz, ky, kx])
    factor = 1.0 / (1.0 + jnp.exp(-out))          # complex sigmoid
    results, split = [], 0
    for l, p in enumerate(parts):
        c = in_channels[l]
        f = factor[:, :, :, :, None, split:split + c]   # (B,D,H,W,1,c)
        results.append(f * p)
        split += c
    return results


if __name__ == "__main__":
    in_channels = [4, 2]        # parts for l = 0 (4 ch) and l = 1 (2 ch)
    kernel_size = 3
    n_radius = 2
    n_theta = 4                 # only used by get_CFint_matrix (synthesized here)
    B, D, H, W = 2, 8, 8, 8

    key = jax.random.PRNGKey(0)
    parts = []
    for l, c in enumerate(in_channels):
        key, kr_, ki_ = jax.random.split(key, 3)
        shape = (B, D, H, W, 2 * l + 1, c)
        parts.append((jax.random.normal(kr_, shape)
                      + 1j * jax.random.normal(ki_, shape)).astype(jnp.complex64))

    key, kk = jax.random.split(key)
    conv_kernel = build_conv_kernel(kk, in_channels, sum(in_channels),
                                    kernel_size, n_radius)

    outs = se3_gated_nonlinearity(parts, conv_kernel, in_channels)
    outs = jax.block_until_ready(outs)

    refs = reference_forward(parts, conv_kernel, in_channels)
    for o, r in zip(outs, refs):
        assert o.shape == r.shape, (o.shape, r.shape)
        err = float(jnp.max(jnp.abs(o - r)))
        assert err < 5e-2, f"max abs err {err}"

    print("KERNEL_OK")
</pallas_src>

<mosaic_0001>
module attributes {stable_mosaic.version = 11 : i64} {
  func.func @_gated_kernel(%arg0: i32, %arg1: memref<1x640x512xbf16, #tpu.memory_space<vmem>>, %arg2: memref<16x640xbf16, #tpu.memory_space<vmem>>, %arg3: memref<1x1x4x512xf32, #tpu.memory_space<vmem>>, %arg4: memref<1x1x4x512xf32, #tpu.memory_space<vmem>>, %arg5: memref<1x3x2x512xf32, #tpu.memory_space<vmem>>, %arg6: memref<1x3x2x512xf32, #tpu.memory_space<vmem>>, %arg7: memref<1x1x4x512xf32, #tpu.memory_space<vmem>>, %arg8: memref<1x1x4x512xf32, #tpu.memory_space<vmem>>, %arg9: memref<1x3x2x512xf32, #tpu.memory_space<vmem>>, %arg10: memref<1x3x2x512xf32, #tpu.memory_space<vmem>>) attributes {dimension_semantics = [#tpu.dimension_semantics<parallel>], iteration_bounds = array<i64: 2>, scalar_prefetch = 0 : i64, scratch_operands = 0 : i64, tpu.core_type = #tpu.core_type<tc>, window_params = [{transform_indices = @transform_0, window_bounds = array<i64: 1, 640, 512>}, {pipeline_mode = #tpu.pipeline_mode<synchronous>, transform_indices = @transform_1, window_bounds = array<i64: 16, 640>}, {transform_indices = @transform_2, window_bounds = array<i64: 1, 1, 4, 512>}, {transform_indices = @transform_3, window_bounds = array<i64: 1, 1, 4, 512>}, {transform_indices = @transform_4, window_bounds = array<i64: 1, 3, 2, 512>}, {transform_indices = @transform_5, window_bounds = array<i64: 1, 3, 2, 512>}, {transform_indices = @transform_6, window_bounds = array<i64: 1, 1, 4, 512>}, {transform_indices = @transform_7, window_bounds = array<i64: 1, 1, 4, 512>}, {transform_indices = @transform_8, window_bounds = array<i64: 1, 3, 2, 512>}, {transform_indices = @transform_9, window_bounds = array<i64: 1, 3, 2, 512>}]} {
    %c0 = arith.constant 0 : index
    %c0_0 = arith.constant 0 : index
    %0 = vector.load %arg2[%c0, %c0_0] : memref<16x640xbf16, #tpu.memory_space<vmem>>, vector<16x640xbf16>
    %c0_1 = arith.constant 0 : index
    %c0_2 = arith.constant 0 : index
    %c0_3 = arith.constant 0 : index
    %1 = vector.load %arg1[%c0_1, %c0_2, %c0_3] : memref<1x640x512xbf16, #tpu.memory_space<vmem>>, vector<1x640x512xbf16>
    %2 = vector.shape_cast %1 : vector<1x640x512xbf16> to vector<640x512xbf16>
    %cst = arith.constant dense<0.000000e+00> : vector<16x512xf32>
    %3 = tpu.matmul %0, %2, %cst {dimension_numbers = #tpu.dot_dimension_numbers<[1], [0], [0], [1], [0, 0, 1, 1], [], []>} : vector<16x640xbf16>, vector<640x512xbf16>, vector<16x512xf32> -> vector<16x512xf32>
    %4 = vector.extract_strided_slice %3 {offsets = [0, 0], sizes = [8, 512], strides = [1, 1]} : vector<16x512xf32> to vector<8x512xf32>
    %5 = vector.extract_strided_slice %3 {offsets = [8, 0], sizes = [8, 512], strides = [1, 1]} : vector<16x512xf32> to vector<8x512xf32>
    %6 = math.absf %4 : vector<8x512xf32>
    %cst_4 = arith.constant 0.000000e+00 : f32
    %7 = vector.broadcast %cst_4 : f32 to vector<8x512xf32>
    %8 = arith.subf %7, %6 : vector<8x512xf32>
    %9 = math.exp %8 : vector<8x512xf32>
    %10 = math.cos %5 : vector<8x512xf32>
    %11 = math.sin %5 : vector<8x512xf32>
    %cst_5 = arith.constant 2.000000e+00 : f32
    %12 = vector.broadcast %cst_5 : f32 to vector<8x512xf32>
    %13 = arith.mulf %12, %9 : vector<8x512xf32>
    %14 = arith.mulf %13, %10 : vector<8x512xf32>
    %cst_6 = arith.constant 1.000000e+00 : f32
    %15 = vector.broadcast %cst_6 : f32 to vector<8x512xf32>
    %16 = arith.addf %15, %14 : vector<8x512xf32>
    %17 = arith.mulf %9, %9 : vector<8x512xf32>
    %18 = arith.addf %16, %17 : vector<8x512xf32>
    %19 = tpu.reciprocal %18 {approx = true} : vector<8x512xf32> -> vector<8x512xf32>
    %cst_7 = arith.constant 0.000000e+00 : f32
    %20 = vector.broadcast %cst_7 : f32 to vector<8x512xf32>
    %21 = arith.cmpf oge, %4, %20 : vector<8x512xf32>
    %22 = arith.mulf %9, %10 : vector<8x512xf32>
    %cst_8 = arith.constant 1.000000e+00 : f32
    %23 = vector.broadcast %cst_8 : f32 to vector<8x512xf32>
    %24 = arith.addf %23, %22 : vector<8x512xf32>
    %25 = arith.addf %9, %10 : vector<8x512xf32>
    %26 = arith.mulf %9, %25 : vector<8x512xf32>
    %27 = arith.select %21, %24, %26 : vector<8x512xi1>, vector<8x512xf32>
    %28 = arith.mulf %27, %19 : vector<8x512xf32>
    %29 = arith.mulf %9, %11 : vector<8x512xf32>
    %30 = arith.mulf %29, %19 : vector<8x512xf32>
    %31 = vector.extract_strided_slice %28 {offsets = [0, 0], sizes = [4, 512], strides = [1, 1]} : vector<8x512xf32> to vector<4x512xf32>
    %32 = vector.shape_cast %31 : vector<4x512xf32> to vector<1x4x512xf32>
    %33 = vector.extract_strided_slice %30 {offsets = [0, 0], sizes = [4, 512], strides = [1, 1]} : vector<8x512xf32> to vector<4x512xf32>
    %34 = vector.shape_cast %33 : vector<4x512xf32> to vector<1x4x512xf32>
    %c0_9 = arith.constant 0 : index
    %c0_10 = arith.constant 0 : index
    %c0_11 = arith.constant 0 : index
    %c0_12 = arith.constant 0 : index
    %35 = vector.load %arg3[%c0_9, %c0_10, %c0_11, %c0_12] : memref<1x1x4x512xf32, #tpu.memory_space<vmem>>, vector<1x1x4x512xf32>
    %36 = vector.shape_cast %35 : vector<1x1x4x512xf32> to vector<1x4x512xf32>
    %c0_13 = arith.constant 0 : index
    %c0_14 = arith.constant 0 : index
    %c0_15 = arith.constant 0 : index
    %c0_16 = arith.constant 0 : index
    %37 = vector.load %arg4[%c0_13, %c0_14, %c0_15, %c0_16] : memref<1x1x4x512xf32, #tpu.memory_space<vmem>>, vector<1x1x4x512xf32>
    %38 = vector.shape_cast %37 : vector<1x1x4x512xf32> to vector<1x4x512xf32>
    %39 = arith.mulf %32, %36 : vector<1x4x512xf32>
    %40 = arith.mulf %34, %38 : vector<1x4x512xf32>
    %41 = arith.subf %39, %40 : vector<1x4x512xf32>
    %c0_17 = arith.constant 0 : index
    %c0_18 = arith.constant 0 : index
    %c0_19 = arith.constant 0 : index
    %c0_20 = arith.constant 0 : index
    %42 = vector.load %arg7[%c0_17, %c0_18, %c0_19, %c0_20] : memref<1x1x4x512xf32, #tpu.memory_space<vmem>>, vector<1x1x4x512xf32>
    %43 = vector.shape_cast %42 : vector<1x1x4x512xf32> to vector<1x4x512xf32>
    %44 = vector.shape_cast %41 : vector<1x4x512xf32> to vector<1x1x4x512xf32>
    tpu.vector_store %arg7[%c0_17, %c0_18, %c0_19, %c0_20], %44 {strides = array<i32>} : memref<1x1x4x512xf32, #tpu.memory_space<vmem>>, vector<1x1x4x512xf32>,
    %45 = arith.mulf %32, %38 : vector<1x4x512xf32>
    %46 = arith.mulf %34, %36 : vector<1x4x512xf32>
    %47 = arith.addf %45, %46 : vector<1x4x512xf32>
    %c0_21 = arith.constant 0 : index
    %c0_22 = arith.constant 0 : index
    %c0_23 = arith.constant 0 : index
    %c0_24 = arith.constant 0 : index
    %48 = vector.load %arg8[%c0_21, %c0_22, %c0_23, %c0_24] : memref<1x1x4x512xf32, #tpu.memory_space<vmem>>, vector<1x1x4x512xf32>
    %49 = vector.shape_cast %48 : vector<1x1x4x512xf32> to vector<1x4x512xf32>
    %50 = vector.shape_cast %47 : vector<1x4x512xf32> to vector<1x1x4x512xf32>
    tpu.vector_store %arg8[%c0_21, %c0_22, %c0_23, %c0_24], %50 {strides = array<i32>} : memref<1x1x4x512xf32, #tpu.memory_space<vmem>>, vector<1x1x4x512xf32>,
    %51 = vector.extract_strided_slice %28 {offsets = [4, 0], sizes = [2, 512], strides = [1, 1]} : vector<8x512xf32> to vector<2x512xf32>
    %52 = vector.shape_cast %51 : vector<2x512xf32> to vector<1x2x512xf32>
    %53 = vector.extract_strided_slice %30 {offsets = [4, 0], sizes = [2, 512], strides = [1, 1]} : vector<8x512xf32> to vector<2x512xf32>
    %54 = vector.shape_cast %53 : vector<2x512xf32> to vector<1x2x512xf32>
    %c0_25 = arith.constant 0 : index
    %c0_26 = arith.constant 0 : index
    %c0_27 = arith.constant 0 : index
    %c0_28 = arith.constant 0 : index
    %55 = vector.load %arg5[%c0_25, %c0_26, %c0_27, %c0_28] : memref<1x3x2x512xf32, #tpu.memory_space<vmem>>, vector<1x3x2x512xf32>
    %56 = vector.shape_cast %55 : vector<1x3x2x512xf32> to vector<3x2x512xf32>
    %c0_29 = arith.constant 0 : index
    %c0_30 = arith.constant 0 : index
    %c0_31 = arith.constant 0 : index
    %c0_32 = arith.constant 0 : index
    %57 = vector.load %arg6[%c0_29, %c0_30, %c0_31, %c0_32] : memref<1x3x2x512xf32, #tpu.memory_space<vmem>>, vector<1x3x2x512xf32>
    %58 = vector.shape_cast %57 : vector<1x3x2x512xf32> to vector<3x2x512xf32>
    %59 = vector.broadcast %52 : vector<1x2x512xf32> to vector<3x2x512xf32>
    %60 = arith.mulf %59, %56 : vector<3x2x512xf32>
    %61 = vector.broadcast %54 : vector<1x2x512xf32> to vector<3x2x512xf32>
    %62 = arith.mulf %61, %58 : vector<3x2x512xf32>
    %63 = arith.subf %60, %62 : vector<3x2x512xf32>
    %c0_33 = arith.constant 0 : index
    %c0_34 = arith.constant 0 : index
    %c0_35 = arith.constant 0 : index
    %c0_36 = arith.constant 0 : index
    %64 = vector.load %arg9[%c0_33, %c0_34, %c0_35, %c0_36] : memref<1x3x2x512xf32, #tpu.memory_space<vmem>>, vector<1x3x2x512xf32>
    %65 = vector.shape_cast %64 : vector<1x3x2x512xf32> to vector<3x2x512xf32>
    %66 = vector.shape_cast %63 : vector<3x2x512xf32> to vector<1x3x2x512xf32>
    tpu.vector_store %arg9[%c0_33, %c0_34, %c0_35, %c0_36], %66 {strides = array<i32>} : memref<1x3x2x512xf32, #tpu.memory_space<vmem>>, vector<1x3x2x512xf32>,
    %67 = vector.broadcast %52 : vector<1x2x512xf32> to vector<3x2x512xf32>
    %68 = arith.mulf %67, %58 : vector<3x2x512xf32>
    %69 = vector.broadcast %54 : vector<1x2x512xf32> to vector<3x2x512xf32>
    %70 = arith.mulf %69, %56 : vector<3x2x512xf32>
    %71 = arith.addf %68, %70 : vector<3x2x512xf32>
    %c0_37 = arith.constant 0 : index
    %c0_38 = arith.constant 0 : index
    %c0_39 = arith.constant 0 : index
    %c0_40 = arith.constant 0 : index
    %72 = vector.load %arg10[%c0_37, %c0_38, %c0_39, %c0_40] : memref<1x3x2x512xf32, #tpu.memory_space<vmem>>, vector<1x3x2x512xf32>
    %73 = vector.shape_cast %72 : vector<1x3x2x512xf32> to vector<3x2x512xf32>
    %74 = vector.shape_cast %71 : vector<3x2x512xf32> to vector<1x3x2x512xf32>
    tpu.vector_store %arg10[%c0_37, %c0_38, %c0_39, %c0_40], %74 {strides = array<i32>} : memref<1x3x2x512xf32, #tpu.memory_space<vmem>>, vector<1x3x2x512xf32>,
    return
  }
  func.func @transform_0(%arg0: i32) -> (i32, i32, i32) {
    %c0_i32 = arith.constant 0 : i32
    %c0_i32_0 = arith.constant 0 : i32
    %c0_i32_1 = arith.constant 0 : i32
    return %arg0, %c0_i32, %c0_i32_0 : i32, i32, i32
  }
  func.func @transform_1(%arg0: i32) -> (i32, i32) {
    %c0_i32 = arith.constant 0 : i32
    %c0_i32_0 = arith.constant 0 : i32
    %c0_i32_1 = arith.constant 0 : i32
    return %c0_i32, %c0_i32_0 : i32, i32
  }
  func.func @transform_2(%arg0: i32) -> (i32, i32, i32, i32) {
    %c0_i32 = arith.constant 0 : i32
    %c0_i32_0 = arith.constant 0 : i32
    %c0_i32_1 = arith.constant 0 : i32
    %c0_i32_2 = arith.constant 0 : i32
    return %arg0, %c0_i32, %c0_i32_0, %c0_i32_1 : i32, i32, i32, i32
  }
  func.func @transform_3(%arg0: i32) -> (i32, i32, i32, i32) {
    %c0_i32 = arith.constant 0 : i32
    %c0_i32_0 = arith.constant 0 : i32
    %c0_i32_1 = arith.constant 0 : i32
    %c0_i32_2 = arith.constant 0 : i32
    return %arg0, %c0_i32, %c0_i32_0, %c0_i32_1 : i32, i32, i32, i32
  }
  func.func @transform_4(%arg0: i32) -> (i32, i32, i32, i32) {
    %c0_i32 = arith.constant 0 : i32
    %c0_i32_0 = arith.constant 0 : i32
    %c0_i32_1 = arith.constant 0 : i32
    %c0_i32_2 = arith.constant 0 : i32
    return %arg0, %c0_i32, %c0_i32_0, %c0_i32_1 : i32, i32, i32, i32
  }
  func.func @transform_5(%arg0: i32) -> (i32, i32, i32, i32) {
    %c0_i32 = arith.constant 0 : i32
    %c0_i32_0 = arith.constant 0 : i32
    %c0_i32_1 = arith.constant 0 : i32
    %c0_i32_2 = arith.constant 0 : i32
    return %arg0, %c0_i32, %c0_i32_0, %c0_i32_1 : i32, i32, i32, i32
  }
  func.func @transform_6(%arg0: i32) -> (i32, i32, i32, i32) {
    %c0_i32 = arith.constant 0 : i32
    %c0_i32_0 = arith.constant 0 : i32
    %c0_i32_1 = arith.constant 0 : i32
    %c0_i32_2 = arith.constant 0 : i32
    return %arg0, %c0_i32, %c0_i32_0, %c0_i32_1 : i32, i32, i32, i32
  }
  func.func @transform_7(%arg0: i32) -> (i32, i32, i32, i32) {
    %c0_i32 = arith.constant 0 : i32
    %c0_i32_0 = arith.constant 0 : i32
    %c0_i32_1 = arith.constant 0 : i32
    %c0_i32_2 = arith.constant 0 : i32
    return %arg0, %c0_i32, %c0_i32_0, %c0_i32_1 : i32, i32, i32, i32
  }
  func.func @transform_8(%arg0: i32) -> (i32, i32, i32, i32) {
    %c0_i32 = arith.constant 0 : i32
    %c0_i32_0 = arith.constant 0 : i32
    %c0_i32_1 = arith.constant 0 : i32
    %c0_i32_2 = arith.constant 0 : i32
    return %arg0, %c0_i32, %c0_i32_0, %c0_i32_1 : i32, i32, i32, i32
  }
  func.func @transform_9(%arg0: i32) -> (i32, i32, i32, i32) {
    %c0_i32 = arith.constant 0 : i32
    %c0_i32_0 = arith.constant 0 : i32
    %c0_i32_1 = arith.constant 0 : i32
    %c0_i32_2 = arith.constant 0 : i32
    return %arg0, %c0_i32, %c0_i32_0, %c0_i32_1 : i32, i32, i32, i32
  }
}

</mosaic_0001>

<bundles_post_ra>
// kernel: tpu_custom_call.1
= control target key start
LH: loop header
LB: loop body
LE: loop exit
PB: predicated region body
PF: predicated region fallthrough
CT: control target
= control target key end

     0   :  { %s5740_s0 = inlined_call_operand.hbm [shape: bf16[2,640,512], index: 0, kind: input, shape index: {}]   ;;  %s5741_s1 = inlined_call_operand.hbm [shape: bf16[16,640], index: 1, kind: input, shape index: {}]   ;;  %s5742_s2 = inlined_call_operand.hbm [shape: f32[2,1,4,512], index: 2, kind: input, shape index: {}]   ;;  %s5743_s3 = inlined_call_operand.hbm [shape: f32[2,1,4,512], index: 3, kind: input, shape index: {}]   ;;  %s5744_s4 = inlined_call_operand.hbm [shape: f32[2,3,2,512], index: 4, kind: input, shape index: {}]   ;;  %s5745_s5 = inlined_call_operand.hbm [shape: f32[2,3,2,512], index: 5, kind: input, shape index: {}]   ;;  %s5746_s6 = inlined_call_operand.hbm [shape: f32[2,1,4,512], index: 6, kind: output, shape index: {0}]   ;;  %s5747_s7 = inlined_call_operand.hbm [shape: f32[2,1,4,512], index: 7, kind: output, shape index: {1}]   ;;  %s5748_s8 = inlined_call_operand.hbm [shape: f32[2,3,2,512], index: 8, kind: output, shape index: {2}]   ;;  %s5749_s9 = inlined_call_operand.hbm [shape: f32[2,3,2,512], index: 9, kind: output, shape index: {3}]  }
   0x1   :  { %5764 = sst [smem:[#allocation25_spill]] %s5740_s0 }
   0x2   :  { %5765 = sst [smem:[#allocation26_spill]] %s5742_s2 }
   0x3   :  { %5766 = sst [smem:[#allocation27_spill]] %s5743_s3 }
   0x4   :  { %5767 = sst [smem:[#allocation28_spill]] %s5744_s4 }
   0x5   :  { %5768 = sst [smem:[#allocation29_spill]] %s5749_s9 }
   0x6   :  { %15 = vsyncpa [#allocation3], 0 }
   0x7   :  { %17 = vsyncpa [#allocation3 + $0x1], 0 }
   0x8   :  { %18 = vsyncpa [#allocation6], 0 }
   0x9   :  { %19 = vsyncpa [#allocation4], 0 }
   0xa   :  { %21 = vsyncpa [#allocation4 + $0x1], 0 }
   0xb   :  { %22 = vsyncpa [#allocation13], 0 }
   0xc   :  { %24 = vsyncpa [#allocation13 + $0x1], 0 }
   0xd   :  { %25 = vsyncpa [#allocation16], 0 }
   0xe   :  { %27 = vsyncpa [#allocation16 + $0x1], 0  ;;  %s4485_s30 = smov 0   ;;  %s4487_s10 = smov 0  }
   0xf   :  { %s4489_s11 = smov 0   ;;  %s4491_s12 = smov 0  }
  0x10 LB: > { %s4506_s13 = sadd.s32 1, %s4407_s12   ;;  %s40_s14 = sadd.s32 1, %s4403_s11  ;;  %s4407_s12 = sphi %s4491_s12, %s5803_s12   ;;  %s4403_s11 = sphi %s4489_s11, %s5807_s11   ;;  %s4399_s10 = sphi %s4487_s10, %s5806_s10   ;;  %s4395_s30 = sphi %s4485_s30, %s5805_s30  }
  0x11   : > { %5769 = sst [smem:[#allocation23_spill]] %s4506_s13  ;;  %s37_s15 = ssub.s32 %s4407_s12, %s4506_s13 }
  0x12   : > { %p5750_p0 = scmp.ne.s32.totalorder %s4403_s11, %s4399_s10  ;;  %p38_p1 = scmp.eq.s32.totalorder %s37_s15, 0 }
  0x13   : > { %p48_p2 = scmp.eq.s32.totalorder %s4407_s12, 0  ;;  %p3742_p4 = scmp.lt.s32.totalorder %s4407_s12, 2 }
  0x14   : > { %s4517_s16 = scalar_select %p38_p1, %s4403_s11, %s40_s14  }
  0x15   : > { %p49_p5 = por %p48_p2, %p5750_p0  ;;  %s319_s17 = sand.u32 1, %s4407_s12  }
  0x16   : > { %5770 = sst [smem:[#allocation24_spill]] %s4517_s16  ;;  %s4524_s18 = sand.u32 1, %s4403_s11  }
  0x17   : > { %s3660_s19 = smul.u32 1280, %s4524_s18  ;;  %p4527_p6 = pnand %p3742_p4, %p49_p5 }
  0x18   : > { %s3661_s21 = smul.u32 20480, %s4407_s12  ;;  %s5772_s0 = sld [smem:[#allocation25_spill]] }
  0x19   : > { %s323_s25 = scalar_lea.vmem [#allocation2], %s3660_s19  ;;  %s4539_s27 = scalar_lea.sflag [#allocation3], %s319_s17 }
  0x1a   : > { %s330_s26 = sshll.u32 %s323_s25, 4  ;;  %p4545_p8 = pneg %p4527_p6  ;;  %s4537_s26 = int_to_ptr.vmem [resolvable:$true] %s330_s26 }
  0x1e   : > { %s4535_s24 = scalar_lea.hbm %s5772_s0, %s3661_s21  ;;  %s4088_s19 = scalar_lea.hbm %s5772_s0, 40960 }
  0x1f   : > { %s4083_s28 = scalar_lea.hbm %s4535_s24, 20480  ;;  %p4089_p11 = scmp.lt.s32.totalorder %s4535_s24, %s5772_s0 }
  0x20   : > { %p4084_p7 = scmp.ne.s32.totalorder %s4535_s24, %s4083_s28  ;;  %p4090_p12 = scmp.lt.s32.totalorder %s4088_s19, %s4083_s28 }
  0x22   : > { %p4086_p9 = pnand %p4545_p8, %p4084_p7  ;;  %p4091_p13 = por %p4090_p12, %p4089_p11 }
  0x24   : > { %p4087_p10 = pneg %p4086_p9 }
  0x26   : > { %p4092_p1 = pnand %p4091_p13, %p4087_p10 }
  0x28   : > { %4095 = shalt.err (!%p4092_p1)
}
  0x29   : > { %s4096_s17 = scalar_lea.vmem %s4537_s26, 20480  ;;  %s4409_s23 = smov [#allocation2]  }
  0x2a   : > { %p4097_p2 = scmp.ne.s32.totalorder %s4537_s26, %s4096_s17  ;;  %s4101_s25 = sshll.u32 %s4409_s23, 4  ;;  %s4102_s25 = int_to_ptr.vmem [resolvable:$false] %s4101_s25 }
  0x2b   : > { %s4103_s14 = scalar_lea.vmem %s4102_s25, 40960  ;;  %p4104_p7 = scmp.lt.s32.totalorder %s4537_s26, %s4102_s25 }
  0x2c   : > { %p4099_p4 = pnand %p4097_p2, %p4545_p8  ;;  %p4105_p9 = scmp.lt.s32.totalorder %s4103_s14, %s4096_s17 }
  0x2e   : > { %p4100_p5 = pneg %p4099_p4  ;;  %p4106_p3 = por %p4105_p9, %p4104_p7 }
  0x30   : > { %p4107_p0 = pnand %p4106_p3, %p4100_p5 }
  0x32   : > { %4110 = shalt.err (!%p4107_p0)
}
  0x33   : > { %s4410_s28 = smov 256   ;;  %s4411_s15 = smov 16  }
  0x34   : > { %3715 = dma.hbm_to_vmem [thread:$0]  (!%p4527_p6), %s4535_s24, 20480, %s4537_s26, %s4539_s27, %s4410_s28, %s4410_s28, %s4411_s15  }
  0x35   : > { %s3662_s19 = smul.u32 24, %s4524_s18  ;;  %s3435_s21 = sshll.u32 %s4524_s18, 4 }
  0x36   : > { %s3656_s22 = sshll.u32 %s4407_s12, 8  ;;  %s5774_s2 = sld [smem:[#allocation26_spill]] }
  0x37   : > { %s344_s14 = scalar_lea.vmem [#allocation7], %s3435_s21 }
  0x38   : > { %s352_s0 = sshll.u32 %s344_s14, 4  ;;  %s353_s0 = int_to_ptr.vmem [resolvable:$true] %s352_s0 }
  0x3c   : > { %s350_s25 = scalar_lea.hbm %s5774_s2, %s3656_s22  ;;  %s4116_s24 = scalar_lea.hbm %s5774_s2, 512 }
  0x3d   : > { %s4111_s16 = scalar_lea.hbm %s350_s25, 256  ;;  %p4117_p11 = scmp.lt.s32.totalorder %s350_s25, %s5774_s2 }
  0x3e   : > { %p4112_p0 = scmp.ne.s32.totalorder %s350_s25, %s4111_s16  ;;  %p4118_p12 = scmp.lt.s32.totalorder %s4116_s24, %s4111_s16 }
  0x40   : > { %p4114_p3 = pnand %p4112_p0, %p4545_p8  ;;  %p4119_p13 = por %p4118_p12, %p4117_p11 }
  0x42   : > { %p4115_p10 = pneg %p4114_p3 }
  0x44   : > { %p4120_p1 = pnand %p4119_p13, %p4115_p10 }
  0x46   : > { %4123 = shalt.err (!%p4120_p1)
}
  0x47   : > { %s4124_s15 = scalar_lea.vmem %s353_s0, 256  ;;  %s4412_s17 = smov [#allocation7]  }
  0x48   : > { %p4125_p2 = scmp.ne.s32.totalorder %s353_s0, %s4124_s15  ;;  %s4129_s23 = sshll.u32 %s4412_s17, 4  ;;  %s4130_s23 = int_to_ptr.vmem [resolvable:$false] %s4129_s23 }
  0x49   : > { %s4131_s14 = scalar_lea.vmem %s4130_s23, 512  ;;  %p4132_p7 = scmp.lt.s32.totalorder %s353_s0, %s4130_s23 }
  0x4a   : > { %p4127_p4 = pnand %p4125_p2, %p4545_p8  ;;  %p4133_p9 = scmp.lt.s32.totalorder %s4131_s14, %s4124_s15 }
  0x4c   : > { %p4128_p5 = pneg %p4127_p4  ;;  %p4134_p0 = por %p4133_p9, %p4132_p7 }
  0x4e   : > { %p4135_p3 = pnand %p4134_p0, %p4128_p5 }
  0x50   : > { %4138 = shalt.err (!%p4135_p3)
}
  0x51   : > { %3718 = dma.hbm_to_vmem [thread:$0]  (!%p4527_p6), %s350_s25, 256, %s353_s0, %s4539_s27  }
  0x52   : > { %s5775_s3 = sld [smem:[#allocation27_spill]]  ;;  %s363_s24 = scalar_lea.vmem [#allocation8], %s3435_s21 }
  0x53   : > { %s371_s26 = sshll.u32 %s363_s24, 4  ;;  %s372_s26 = int_to_ptr.vmem [resolvable:$true] %s371_s26 }
  0x58   : > { %s369_s16 = scalar_lea.hbm %s5775_s3, %s3656_s22  ;;  %s4144_s23 = scalar_lea.hbm %s5775_s3, 512 }
  0x59   : > { %s4139_s28 = scalar_lea.hbm %s369_s16, 256  ;;  %p4145_p13 = scmp.lt.s32.totalorder %s369_s16, %s5775_s3 }
  0x5a   : > { %p4140_p10 = scmp.ne.s32.totalorder %s369_s16, %s4139_s28  ;;  %p4146_p1 = scmp.lt.s32.totalorder %s4144_s23, %s4139_s28 }
  0x5c   : > { %p4142_p11 = pnand %p4140_p10, %p4545_p8  ;;  %p4147_p2 = por %p4146_p1, %p4145_p13 }
  0x5e   : > { %p4143_p12 = pneg %p4142_p11 }
  0x60   : > { %p4148_p4 = pnand %p4147_p2, %p4143_p12 }
  0x62   : > { %4151 = shalt.err (!%p4148_p4)
}
  0x63   : > { %s4152_s21 = scalar_lea.vmem %s372_s26, 256  ;;  %s4413_s22 = smov [#allocation8]  }
  0x64   : > { %p4153_p5 = scmp.ne.s32.totalorder %s372_s26, %s4152_s21  ;;  %s4157_s25 = sshll.u32 %s4413_s22, 4  ;;  %s4158_s25 = int_to_ptr.vmem [resolvable:$false] %s4157_s25 }
  0x65   : > { %s4159_s9 = scalar_lea.vmem %s4158_s25, 512  ;;  %p4160_p0 = scmp.lt.s32.totalorder %s372_s26, %s4158_s25 }
  0x66   : > { %p4155_p7 = pnand %p4153_p5, %p4545_p8  ;;  %p4161_p3 = scmp.lt.s32.totalorder %s4159_s9, %s4152_s21 }
  0x68   : > { %p4156_p9 = pneg %p4155_p7  ;;  %p4162_p10 = por %p4161_p3, %p4160_p0 }
  0x6a   : > { %p4163_p11 = pnand %p4162_p10, %p4156_p9 }
  0x6c   : > { %4166 = shalt.err (!%p4163_p11)
}
  0x6d   : > { %3721 = dma.hbm_to_vmem [thread:$0]  (!%p4527_p6), %s369_s16, 256, %s372_s26, %s4539_s27  }
  0x6e   : > { %s3663_s13 = smul.u32 384, %s4407_s12  ;;  %s382_s24 = scalar_lea.vmem [#allocation9], %s3662_s19 }
  0x6f   : > { %s389_s28 = sshll.u32 %s382_s24, 4  ;;  %s5776_s4 = sld [smem:[#allocation28_spill]]  ;;  %s4614_s28 = int_to_ptr.vmem [resolvable:$true] %s389_s28 }
  0x75   : > { %s4621_s23 = scalar_lea.hbm %s5776_s4, %s3663_s13  ;;  %s4172_s0 = scalar_lea.hbm %s5776_s4, 768 }
  0x76   : > { %s4167_s14 = scalar_lea.hbm %s4621_s23, 384  ;;  %p4173_p2 = scmp.lt.s32.totalorder %s4621_s23, %s5776_s4 }
  0x77   : > { %p4168_p12 = scmp.ne.s32.totalorder %s4621_s23, %s4167_s14  ;;  %p4174_p4 = scmp.lt.s32.totalorder %s4172_s0, %s4167_s14 }
  0x79   : > { %p4170_p13 = pnand %p4168_p12, %p4545_p8  ;;  %p4175_p5 = por %p4174_p4, %p4173_p2 }
  0x7b   : > { %p4171_p1 = pneg %p4170_p13 }
  0x7d   : > { %p4176_p7 = pnand %p4175_p5, %p4171_p1 }
  0x7f   : > { %4179 = shalt.err (!%p4176_p7)
}
  0x80   : > { %s4180_s25 = scalar_lea.vmem %s4614_s28, 384  ;;  %s4414_s9 = smov [#allocation9]  }
  0x81   : > { %p4181_p9 = scmp.ne.s32.totalorder %s4614_s28, %s4180_s25  ;;  %s4185_s24 = sshll.u32 %s4414_s9, 4  ;;  %s4186_s24 = int_to_ptr.vmem [resolvable:$false] %s4185_s24 }
  0x82   : > { %s4187_s15 = scalar_lea.vmem %s4186_s24, 768  ;;  %p4188_p10 = scmp.lt.s32.totalorder %s4614_s28, %s4186_s24 }
  0x83   : > { %p4183_p0 = pnand %p4181_p9, %p4545_p8  ;;  %p4189_p11 = scmp.lt.s32.totalorder %s4187_s15, %s4180_s25 }
  0x85   : > { %p4184_p3 = pneg %p4183_p0  ;;  %p4190_p12 = por %p4189_p11, %p4188_p10 }
  0x87   : > { %p4191_p13 = pnand %p4190_p12, %p4184_p3 }
  0x89   : > { %4194 = shalt.err (!%p4191_p13)
}
  0x8a   : > { %s5755_s17 = smov 128   ;;  %s5756_s14 = smov 8  }
  0x8b   : > { %3724 = dma.hbm_to_vmem [thread:$0]  (!%p4527_p6), %s4621_s23, 384, %s4614_s28, %s4539_s27, %s5755_s17, %s5755_s17, %s5756_s14  }
  0x8c   : > { %s4648_s16 = sadd.s32 4294967295, %s4407_s12   ;;  %s5754_s26 = sadd.s32 4294967294, %s4407_s12  }
  0x8d   : > { %p53_p1 = scmp.ne.s32.totalorder %s4399_s10, %s4395_s30  ;;  %p5757_p2 = scmp.eq.s32.totalorder %s4648_s16, 0 }
  0x8e   : > { %p202_p4 = scmp.eq.s32.totalorder %s4648_s16, 1  ;;  %p208_p5 = scmp.eq.s32.totalorder %s5754_s26, 1 }
  0x8f   : > { %p4659_p7 = por %p5757_p2, %p53_p1  ;;  %p3431_p9 = scmp.ge.s32.totalorder %s4407_s12, 1 }
  0x90   : > { %p5778_p0 = scmp.ne.s32.totalorder %s4403_s11, %s4399_s10  ;;  %p4671_p10 = por %p208_p5, %p53_p1 }
  0x91   : > { %s5777_s0 = scalar_select %p4659_p7, 1, 0 }
  0x92   : > { %p4667_p3 = por %p202_p4, %p5778_p0  ;;  %p293_p11 = scmp.lt.s32.totalorder %s4407_s12, 3 }
  0x93   : > { %s5780_s23 = scalar_select %p4671_p10, 1, 0 }
  0x94   : > { %s5779_s28 = scalar_select %p4667_p3, 1, 0 }
  0x95   : > { %p4676_p12 = pnand %p3431_p9, %p293_p11  ;;  %s4417_s22 = smov [#allocation5]  }
  0x96   : > { %s305_s25 = sshll.u32 %s4417_s22, 4  ;;  %s4689_s15 = scalar_lea.hbm %s5745_s5, %s3663_s13  ;;  %s4680_s25 = int_to_ptr.vmem [resolvable:$true] %s305_s25 }
  0x97   : > { %s5781_s21 = scalar_select %p4676_p12, 1, 0 }
  0x98   : > { %p3708_p13 = pneg %p4676_p12  ;;  %s403_s26 = scalar_lea.vmem [#allocation10], %s3662_s19 }
  0x99   : > { %s410_s17 = sshll.u32 %s403_s26, 4  ;;  %s4195_s22 = scalar_lea.hbm %s4689_s15, 384  ;;  %s411_s17 = int_to_ptr.vmem [resolvable:$true] %s410_s17 }
  0x9a   : > { %p4695_p1 = pnand %p3708_p13, %p5757_p2  ;;  %p4196_p4 = scmp.ne.s32.totalorder %s4689_s15, %s4195_s22 }
  0x9b   : > { %s4200_s18 = scalar_lea.hbm %s5745_s5, 768  ;;  %p4201_p0 = scmp.lt.s32.totalorder %s4689_s15, %s5745_s5 }
  0x9c   : > { %s5782_s14 = scalar_select %p4695_p1, 1, 0 }
  0x9d   : > { %p4198_p5 = pnand %p4196_p4, %p4545_p8  ;;  %p4202_p11 = scmp.lt.s32.totalorder %s4200_s18, %s4195_s22 }
  0x9f   : > { %p4199_p9 = pneg %p4198_p5  ;;  %p4203_p10 = por %p4202_p11, %p4201_p0 }
  0xa1   : > { %p4204_p13 = pnand %p4203_p10, %p4199_p9 }
  0xa3   : > { %4207 = shalt.err (!%p4204_p13)
}
  0xa4   : > { %s4208_s19 = scalar_lea.vmem %s411_s17, 384  ;;  %s4418_s26 = smov [#allocation10]  }
  0xa5   : > { %p4209_p2 = scmp.ne.s32.totalorder %s411_s17, %s4208_s19  ;;  %s4213_s3 = sshll.u32 %s4418_s26, 4  ;;  %s4214_s3 = int_to_ptr.vmem [resolvable:$false] %s4213_s3 }
  0xa6   : > { %s4215_s4 = scalar_lea.vmem %s4214_s3, 768  ;;  %p4216_p4 = scmp.lt.s32.totalorder %s411_s17, %s4214_s3 }
  0xa7   : > { %p4211_p3 = pnand %p4209_p2, %p4545_p8  ;;  %p4217_p5 = scmp.lt.s32.totalorder %s4215_s4, %s4208_s19 }
  0xa9   : > { %p4212_p7 = pneg %p4211_p3  ;;  %p4218_p12 = por %p4217_p5, %p4216_p4 }
  0xab   : > { %p4219_p1 = pnand %p4218_p12, %p4212_p7 }
  0xad   : > { %4222 = shalt.err (!%p4219_p1)
}
  0xae   : > { %s5783_s2 = smov 8   ;;  %s5784_s22 = smov 128  }
  0xaf   : > { %3727 = dma.hbm_to_vmem [thread:$0]  (!%p4527_p6), %s4689_s15, 384, %s411_s17, %s4539_s27, %s5784_s22, %s5784_s22, %s5783_s2  }
  0xb0   : > { %p5785_p8 = scmp.ne.s32.totalorder %s5782_s14, 0  ;;  %s4234_s29 = scalar_lea.vmem %s4680_s25, 640 }
  0xb1   : > { %p4235_p3 = scmp.ne.s32.totalorder %s4680_s25, %s4234_s29  ;;  %p4242_p7 = scmp.lt.s32.totalorder %s4680_s25, %s4680_s25 }
  0xb2   : > { %p4225_p2 = pneg %p5785_p8  ;;  %p4243_p12 = scmp.lt.s32.totalorder %s4234_s29, %s4234_s29 }
  0xb4   : > { %p4237_p10 = pnand %p4235_p3, %p4225_p2  ;;  %p4244_p1 = por %p4243_p12, %p4242_p7 }
  0xb6   : > { %p4238_p9 = pneg %p4237_p10 }
  0xb8   : > { %p4245_p0 = pnand %p4244_p1, %p4238_p9 }
  0xba   : > { %4248 = shalt.err (!%p4245_p0)
}
  0xbb   : > { %s4419_s3 = smov 320   ;;  %s4420_s4 = smov 20  }
  0xbc   : > { %3711 = dma.hbm_to_vmem [thread:$0]  (!%p5785_p8), %s5741_s1, 640, %s4680_s25, [#allocation6], %s4419_s3, %s4419_s3, %s4420_s4  }
  0xbd   : > { %p5786_p6 = scmp.ne.s32.totalorder %s5781_s21, 0 }
  0xbe   : > { %s424_s27 = sand.u32 (!%p5786_p6), 1, %s4648_s16   ;;  %s4735_s17 = sand.u32 (!%p5786_p6), 1, %s4399_s10  }
  0xbf   : > { %422 = sbr.rel (%p5786_p6) target bundleno = 792 (0x318), region = 44  ;;  %s425_s13 = scalar_lea.sflag (!%p5786_p6), [#allocation3], %s424_s27 }
  0xc0   : > { %s3666_s15 = smul.u32 (!%p5786_p6), 1280, %s4735_s17  ;;  %p5787_p11 = scmp.ne.s32.totalorder (!%p5786_p6), %s5777_s0, 0 }
  0xc2   : > { %s4740_s18 = scalar_lea.vmem (!%p5786_p6), [#allocation2], %s3666_s15 }
  0xc4   : > { %4370 = dma.done.wait (%p5787_p11), %s425_s13, 20480  }
  0xc5   : > { %4372 = vsyncadd (%p5787_p11), %s425_s13, 4294946816  ;;  %p5788_p13 = scmp.eq.s32.totalorder %s4648_s16, 0 }
  0xc7   : > { %4374 = dma.done.wait (%p5788_p13), [#allocation6], 640   ;;  %p5789_p4 = pmov %p5788_p13 }
  0xc8   : > { %s4751_s14 = sshll.u32 %s4735_s17, 4 }
  0xc9   : > { %4376 = vsyncadd (%p5789_p4), [#allocation6], 4294966656  ;;  %s441_s21 = scalar_lea.vmem [#allocation7], %s4751_s14 }
  0xca   : > { %4378 = dma.done.wait (%p5787_p11), %s425_s13, 1280  }
  0xcb   : > { %4380 = vsyncadd (%p5787_p11), %s425_s13, 4294966016  ;;  %v3794_v0 = vld [vmem:[%s4740_s18 + $0xe4] ss:$16 sps:$4 sm:$0xff]   ;;  %v3798_v2 = vld [vmem:[%s4740_s18 + $0xe0] ss:$16 sps:$4 sm:$0xff]   ;;  %s5030_s0 = smul.u32 24, %s4735_s17 }
  0xcc   : > { %v3796_v1 = vld [vmem:[%s4740_s18 + $0x2e4] ss:$16 sps:$4 sm:$0xff]   ;;  %1531 = vmatprep.subr.bf16.mxu0 %v3794_v0  ;;  %v3799_v3 = vld [vmem:[%s4740_s18 + $0x2e0] ss:$16 sps:$4 sm:$0xff]   ;;  %s450_s24 = scalar_lea.vmem [#allocation8], %s4751_s14  ;;  %s5317_s26 = scalar_lea.vmem [#allocation12], %s4751_s14 }
  0xcd   : > { %1574 = vmatprep.subr.bf16.mxu1 %v3796_v1  ;;  %v3800_v4 = vld [vmem:[%s4740_s18 + $0xc4] ss:$16 sps:$4 sm:$0xff]   ;;  %1532 = vmatpush1.bf16.msra.mxu0 %v3798_v2  ;;  %v3804_v6 = vld [vmem:[%s4740_s18 + $0xc0] ss:$16 sps:$4 sm:$0xff]   ;;  %s5059_s25 = scalar_lea.vmem [#allocation9], %s5030_s0  ;;  %s468_s19 = scalar_lea.vmem [#allocation10], %s5030_s0 }
  0xce   : > { %1575 = vmatpush1.bf16.msra.mxu1 %v3799_v3  ;;  %v3802_v5 = vld [vmem:[%s4740_s18 + $0x2c4] ss:$16 sps:$4 sm:$0xff]   ;;  %1533 = vmatprep.subr.bf16.mxu0 %v3800_v4  ;;  %v3805_v7 = vld [vmem:[%s4740_s18 + $0x2c0] ss:$16 sps:$4 sm:$0xff]   ;;  %v3901_v3 = vld [vmem:[%s4740_s18 + $0xec] ss:$16 sps:$4 sm:$0xff]  }
  0xcf   : > { %1576 = vmatprep.subr.bf16.mxu1 %v3802_v5  ;;  %v3806_v8 = vld [vmem:[%s4740_s18 + $0xa4] ss:$16 sps:$4 sm:$0xff]   ;;  %v3810_v10 = vld [vmem:[%s4740_s18 + $0xa0] ss:$16 sps:$4 sm:$0xff]   ;;  %v4829_v5 = vld [vmem:[#allocation5 + $0x8] ss:$20 sps:$4 sm:$0xff]  }
  0xd0   : > { %v3808_v9 = vld [vmem:[%s4740_s18 + $0x2a4] ss:$16 sps:$4 sm:$0xff]   ;;  %v3811_v11 = vld [vmem:[%s4740_s18 + $0x2a0] ss:$16 sps:$4 sm:$0xff]   ;;  %s5328_s2 = scalar_lea.vmem [#allocation11], %s4751_s14  ;;  %s3658_s22 = sshll.u32 %s4648_s16, 8 }
  0xd1   : > { %1534 = vmatpush1.bf16.msra.mxu0 %v3804_v6  ;;  %v3812_v12 = vld [vmem:[%s4740_s18 + $0x84] ss:$16 sps:$4 sm:$0xff]   ;;  %v3816_v14 = vld [vmem:[%s4740_s18 + $0x80] ss:$16 sps:$4 sm:$0xff]   ;;  %s3145_s29 = sshll.u32 %s5317_s26, 4  ;;  %s5528_s20 = scalar_lea.hbm %s5747_s7, %s3658_s22  ;;  %s5533_s29 = int_to_ptr.vmem [resolvable:$true] %s3145_s29 }
  0xd2   : > { %1577 = vmatpush1.bf16.msra.mxu1 %v3805_v7  ;;  %1535 = vmatprep.subr.bf16.mxu0 %v3806_v8  ;;  %v3814_v13 = vld [vmem:[%s4740_s18 + $0x284] ss:$16 sps:$4 sm:$0xff]   ;;  %v3817_v15 = vld [vmem:[%s4740_s18 + $0x280] ss:$16 sps:$4 sm:$0xff]   ;;  %v3899_v7 = vld [vmem:[%s4740_s18 + $0xe8] ss:$16 sps:$4 sm:$0xff]  }
  0xd3   : > { %1578 = vmatprep.subr.bf16.mxu1 %v3808_v9  ;;  %v3818_v16 = vld [vmem:[%s4740_s18 + $0x64] ss:$16 sps:$4 sm:$0xff]   ;;  %v3822_v18 = vld [vmem:[%s4740_s18 + $0x60] ss:$16 sps:$4 sm:$0xff]   ;;  %v3907_v9 = vld [vmem:[%s4740_s18 + $0xcc] ss:$16 sps:$4 sm:$0xff]  }
  0xd4   : > { %v3820_v17 = vld [vmem:[%s4740_s18 + $0x264] ss:$16 sps:$4 sm:$0xff]   ;;  %v3823_v19 = vld [vmem:[%s4740_s18 + $0x260] ss:$16 sps:$4 sm:$0xff]   ;;  %s3131_s9 = sshll.u32 %s5328_s2, 4  ;;  %s5536_s15 = scalar_lea.vmem [#allocation14], %s5030_s0  ;;  %s5549_s9 = int_to_ptr.vmem [resolvable:$true] %s3131_s9 }
  0xd5   : > { %1536 = vmatpush1.bf16.msra.mxu0 %v3810_v10  ;;  %v3824_v20 = vld [vmem:[%s4740_s18 + $0x44] ss:$16 sps:$4 sm:$0xff]   ;;  %v3828_v22 = vld [vmem:[%s4740_s18 + $0x40] ss:$16 sps:$4 sm:$0xff]   ;;  %s3158_s13 = sshll.u32 %s5536_s15, 4  ;;  %p5798_p8 = scmp.ne.s32.totalorder %s5779_s28, 0  ;;  %s5563_s13 = int_to_ptr.vmem [resolvable:$true] %s3158_s13 }
  0xd6   : > { %1579 = vmatpush1.bf16.msra.mxu1 %v3811_v11  ;;  %1537 = vmatprep.subr.bf16.mxu0 %v3812_v12  ;;  %v3826_v21 = vld [vmem:[%s4740_s18 + $0x244] ss:$16 sps:$4 sm:$0xff]   ;;  %v3829_v23 = vld [vmem:[%s4740_s18 + $0x240] ss:$16 sps:$4 sm:$0xff]   ;;  %v3905_v11 = vld [vmem:[%s4740_s18 + $0xc8] ss:$16 sps:$4 sm:$0xff]  }
  0xd7   : > { %1580 = vmatprep.subr.bf16.mxu1 %v3814_v13  ;;  %v3830_v24 = vld [vmem:[%s4740_s18 + $0x24] ss:$16 sps:$4 sm:$0xff]   ;;  %v3834_v26 = vld [vmem:[%s4740_s18 + $0x20] ss:$16 sps:$4 sm:$0xff]   ;;  %v3913_v13 = vld [vmem:[%s4740_s18 + $0xac] ss:$16 sps:$4 sm:$0xff]  }
  0xd8   : > { %v3832_v25 = vld [vmem:[%s4740_s18 + $0x224] ss:$16 sps:$4 sm:$0xff]   ;;  %v3835_v27 = vld [vmem:[%s4740_s18 + $0x220] ss:$16 sps:$4 sm:$0xff]  }
  0xd9   : > { %1538 = vmatpush1.bf16.msra.mxu0 %v3816_v14  ;;  %v3836_v28 = vld [vmem:[%s4740_s18 + $0x4] ss:$16 sps:$4 sm:$0xff]   ;;  %v3840_v30 = vld [vmem:[%s4740_s18] ss:$16 sps:$4 sm:$0xff]   ;;  %v4421_v14 = vmov 0  }
  0xda   : > { %1581 = vmatpush1.bf16.msra.mxu1 %v3817_v15  ;;  %1539 = vmatprep.subr.bf16.mxu0 %v3818_v16  ;;  %v3838_v29 = vld [vmem:[%s4740_s18 + $0x204] ss:$16 sps:$4 sm:$0xff]   ;;  %v3841_v31 = vld [vmem:[%s4740_s18 + $0x200] ss:$16 sps:$4 sm:$0xff]   ;;  %v3911_v16 = vld [vmem:[%s4740_s18 + $0xa8] ss:$16 sps:$4 sm:$0xff]  }
  0xdb   : > { %1582 = vmatprep.subr.bf16.mxu1 %v3820_v17  ;;  %v3842_v32 = vld [vmem:[%s4740_s18 + $0x1e4] ss:$16 sps:$4 sm:$0xff]   ;;  %v3846_v34 = vld [vmem:[%s4740_s18 + $0x1e0] ss:$16 sps:$4 sm:$0xff]  }
  0xdc   : > { %v3844_v33 = vld [vmem:[%s4740_s18 + $0x3e4] ss:$16 sps:$4 sm:$0xff]   ;;  %v3847_v35 = vld [vmem:[%s4740_s18 + $0x3e0] ss:$16 sps:$4 sm:$0xff]  }
  0xdd   : > { %1540 = vmatpush1.bf16.msra.mxu0 %v3822_v18  ;;  %v3848_v36 = vld [vmem:[%s4740_s18 + $0x1c4] ss:$16 sps:$4 sm:$0xff]   ;;  %v3852_v38 = vld [vmem:[%s4740_s18 + $0x1c0] ss:$16 sps:$4 sm:$0xff]   ;;  %v3919_v18 = vld [vmem:[%s4740_s18 + $0x8c] ss:$16 sps:$4 sm:$0xff]  }
  0xde   : > { %1583 = vmatpush1.bf16.msra.mxu1 %v3823_v19  ;;  %1541 = vmatprep.subr.bf16.mxu0 %v3824_v20  ;;  %v3850_v37 = vld [vmem:[%s4740_s18 + $0x3c4] ss:$16 sps:$4 sm:$0xff]   ;;  %v3853_v39 = vld [vmem:[%s4740_s18 + $0x3c0] ss:$16 sps:$4 sm:$0xff]   ;;  %v3917_v20 = vld [vmem:[%s4740_s18 + $0x88] ss:$16 sps:$4 sm:$0xff]  }
  0xdf   : > { %1584 = vmatprep.subr.bf16.mxu1 %v3826_v21  ;;  %v3854_v40 = vld [vmem:[%s4740_s18 + $0x1a4] ss:$16 sps:$4 sm:$0xff]   ;;  %v3858_v42 = vld [vmem:[%s4740_s18 + $0x1a0] ss:$16 sps:$4 sm:$0xff]  }
  0xe0   : > { %v3856_v41 = vld [vmem:[%s4740_s18 + $0x3a4] ss:$16 sps:$4 sm:$0xff]   ;;  %v3859_v43 = vld [vmem:[%s4740_s18 + $0x3a0] ss:$16 sps:$4 sm:$0xff]  }
  0xe1   : > { %1542 = vmatpush1.bf16.msra.mxu0 %v3828_v22  ;;  %v3860_v44 = vld [vmem:[%s4740_s18 + $0x184] ss:$16 sps:$4 sm:$0xff]   ;;  %v3864_v46 = vld [vmem:[%s4740_s18 + $0x180] ss:$16 sps:$4 sm:$0xff]   ;;  %v3925_v22 = vld [vmem:[%s4740_s18 + $0x6c] ss:$16 sps:$4 sm:$0xff]  }
  0xe2   : > { %1585 = vmatpush1.bf16.msra.mxu1 %v3829_v23  ;;  %1543 = vmatprep.subr.bf16.mxu0 %v3830_v24  ;;  %v3862_v45 = vld [vmem:[%s4740_s18 + $0x384] ss:$16 sps:$4 sm:$0xff]   ;;  %v3865_v47 = vld [vmem:[%s4740_s18 + $0x380] ss:$16 sps:$4 sm:$0xff]   ;;  %v3923_v24 = vld [vmem:[%s4740_s18 + $0x68] ss:$16 sps:$4 sm:$0xff]  }
  0xe3   : > { %1586 = vmatprep.subr.bf16.mxu1 %v3832_v25  ;;  %v3866_v48 = vld [vmem:[%s4740_s18 + $0x164] ss:$16 sps:$4 sm:$0xff]   ;;  %v4808_v51 = vld [vmem:[#allocation5 + $0xc] ss:$20 sps:$4 sm:$0xff]  }
  0xe4   : > { %v3892_v49 = vld [vmem:[#allocation5 + $0x4] ss:$20 sps:$4 sm:$0xff]   ;;  %v3870_v52 = vld [vmem:[%s4740_s18 + $0x160] ss:$16 sps:$4 sm:$0xff]   ;;  %1606 = vmatprep.mubr.bf16.mxu1 %v4808_v51 }
  0xe5   : > { %1544 = vmatpush1.bf16.msra.mxu0 %v3834_v26  ;;  %v3868_v50 = vld [vmem:[%s4740_s18 + $0x364] ss:$16 sps:$4 sm:$0xff]   ;;  %1563 = vmatprep.mubr.bf16.mxu0 %v3892_v49  ;;  %v3871_v53 = vld [vmem:[%s4740_s18 + $0x360] ss:$16 sps:$4 sm:$0xff]   ;;  %v3931_v26 = vld [vmem:[%s4740_s18 + $0x4c] ss:$16 sps:$4 sm:$0xff]  }
  0xe6   : > { %1587 = vmatpush1.bf16.msra.mxu1 %v3835_v27  ;;  %1545 = vmatprep.subr.bf16.mxu0 %v3836_v28  ;;  %v3872_v54 = vld [vmem:[%s4740_s18 + $0x144] ss:$16 sps:$4 sm:$0xff]   ;;  %v3876_v56 = vld [vmem:[%s4740_s18 + $0x140] ss:$16 sps:$4 sm:$0xff]   ;;  %v3929_v28 = vld [vmem:[%s4740_s18 + $0x48] ss:$16 sps:$4 sm:$0xff]  }
  0xe7   : > { %1588 = vmatprep.subr.bf16.mxu1 %v3838_v29  ;;  %v3874_v55 = vld [vmem:[%s4740_s18 + $0x344] ss:$16 sps:$4 sm:$0xff]   ;;  %v3877_v57 = vld [vmem:[%s4740_s18 + $0x340] ss:$16 sps:$4 sm:$0xff]  }
  0xe8   : > { %v3878_v58 = vld [vmem:[%s4740_s18 + $0x124] ss:$16 sps:$4 sm:$0xff]   ;;  %v3882_v60 = vld [vmem:[%s4740_s18 + $0x120] ss:$16 sps:$4 sm:$0xff]  }
  0xe9   : > { %1546 = vmatpush1.bf16.msra.mxu0 %v3840_v30  ;;  %v3880_v59 = vld [vmem:[%s4740_s18 + $0x324] ss:$16 sps:$4 sm:$0xff]   ;;  %v3883_v61 = vld [vmem:[%s4740_s18 + $0x320] ss:$16 sps:$4 sm:$0xff]   ;;  %v3937_v30 = vld [vmem:[%s4740_s18 + $0x2c] ss:$16 sps:$4 sm:$0xff]  }
  0xea   : > { %1589 = vmatpush1.bf16.msra.mxu1 %v3841_v31  ;;  %1547 = vmatprep.subr.bf16.mxu0 %v3842_v32  ;;  %v3884_v62 = vld [vmem:[%s4740_s18 + $0x104] ss:$16 sps:$4 sm:$0xff]   ;;  %v3888_v0 = vld [vmem:[%s4740_s18 + $0x100] ss:$16 sps:$4 sm:$0xff]   ;;  %v3935_v32 = vld [vmem:[%s4740_s18 + $0x28] ss:$16 sps:$4 sm:$0xff]  }
  0xeb   : > { %1590 = vmatprep.subr.bf16.mxu1 %v3844_v33  ;;  %v3886_v63 = vld [vmem:[%s4740_s18 + $0x304] ss:$16 sps:$4 sm:$0xff]   ;;  %v3889_v1 = vld [vmem:[%s4740_s18 + $0x300] ss:$16 sps:$4 sm:$0xff]  }
  0xec   : > { %v3898_v2 = vld [vmem:[%s4740_s18 + $0x4e4] ss:$16 sps:$4 sm:$0xff]   ;;  %v3896_v6 = vld [vmem:[%s4740_s18 + $0x4e0] ss:$16 sps:$4 sm:$0xff]  }
  0xed   : > { %1548 = vmatpush2.bf16.msra.mxu0 %v3846_v34  ;;  %v4827_v4 = vld [vmem:[#allocation5] ss:$20 sps:$4 sm:$0xff]   ;;  %v3943_v34 = vld [vmem:[%s4740_s18 + $0xc] ss:$16 sps:$4 sm:$0xff]  }
  0xee   : > { %1591 = vmatpush2.bf16.msra.mxu1 %v3847_v35  ;;  %1549 = vmatprep.subr.bf16.mxu0 %v3848_v36  ;;  %v3904_v8 = vld [vmem:[%s4740_s18 + $0x4c4] ss:$16 sps:$4 sm:$0xff]   ;;  %v3902_v10 = vld [vmem:[%s4740_s18 + $0x4c0] ss:$16 sps:$4 sm:$0xff]   ;;  %v3941_v36 = vld [vmem:[%s4740_s18 + $0x8] ss:$16 sps:$4 sm:$0xff]  }
  0xef   : > { %1592 = vmatprep.subr.bf16.mxu1 %v3850_v37  ;;  %v3910_v12 = vld [vmem:[%s4740_s18 + $0x4a4] ss:$16 sps:$4 sm:$0xff]   ;;  %v3908_v15 = vld [vmem:[%s4740_s18 + $0x4a0] ss:$16 sps:$4 sm:$0xff]   ;;  %v3947_v37 = vld [vmem:[%s4740_s18 + $0x1ec] ss:$16 sps:$4 sm:$0xff]  }
  0xf0   : > { %v3916_v17 = vld [vmem:[%s4740_s18 + $0x484] ss:$16 sps:$4 sm:$0xff]   ;;  %v3914_v19 = vld [vmem:[%s4740_s18 + $0x480] ss:$16 sps:$4 sm:$0xff]  }
  0xf1   : > { %1550 = vmatpush2.bf16.msra.mxu0 %v3852_v38  ;;  %v3922_v21 = vld [vmem:[%s4740_s18 + $0x464] ss:$16 sps:$4 sm:$0xff]   ;;  %v3920_v23 = vld [vmem:[%s4740_s18 + $0x460] ss:$16 sps:$4 sm:$0xff]   ;;  %v3950_v38 = vld [vmem:[%s4740_s18 + $0x2ec] ss:$16 sps:$4 sm:$0xff]  }
  0xf2   : > { %1593 = vmatpush2.bf16.msra.mxu1 %v3853_v39  ;;  %1551 = vmatprep.subr.bf16.mxu0 %v3854_v40  ;;  %v3928_v25 = vld [vmem:[%s4740_s18 + $0x444] ss:$16 sps:$4 sm:$0xff]   ;;  %v3926_v27 = vld [vmem:[%s4740_s18 + $0x440] ss:$16 sps:$4 sm:$0xff]   ;;  %v3945_v40 = vld [vmem:[%s4740_s18 + $0x1e8] ss:$16 sps:$4 sm:$0xff]  }
  0xf3   : > { %1594 = vmatprep.subr.bf16.mxu1 %v3856_v41  ;;  %v3934_v29 = vld [vmem:[%s4740_s18 + $0x424] ss:$16 sps:$4 sm:$0xff]   ;;  %v3932_v31 = vld [vmem:[%s4740_s18 + $0x420] ss:$16 sps:$4 sm:$0xff]   ;;  %v3948_v41 = vld [vmem:[%s4740_s18 + $0x2e8] ss:$16 sps:$4 sm:$0xff]  }
  0xf4   : > { %v3940_v33 = vld [vmem:[%s4740_s18 + $0x404] ss:$16 sps:$4 sm:$0xff]   ;;  %v3938_v35 = vld [vmem:[%s4740_s18 + $0x400] ss:$16 sps:$4 sm:$0xff]  }
  0xf5   : > { %1552 = vmatpush2.bf16.msra.mxu0 %v3858_v42  ;;  %v4866_v39 = vld [vmem:[#allocation5 + $0x10] ss:$20 sps:$4 sm:$0xff]   ;;  %v3953_v42 = vld [vmem:[%s4740_s18 + $0x1cc] ss:$16 sps:$4 sm:$0xff]  }
  0xf6   : > { %1595 = vmatpush2.bf16.msra.mxu1 %v3859_v43  ;;  %1553 = vmatprep.subr.bf16.mxu0 %v3860_v44  ;;  %v3956_v43 = vld [vmem:[%s4740_s18 + $0x2cc] ss:$16 sps:$4 sm:$0xff]   ;;  %v3951_v44 = vld [vmem:[%s4740_s18 + $0x1c8] ss:$16 sps:$4 sm:$0xff]  }
  0xf7   : > { %1596 = vmatprep.subr.bf16.mxu1 %v3862_v45  ;;  %v3954_v45 = vld [vmem:[%s4740_s18 + $0x2c8] ss:$16 sps:$4 sm:$0xff]  }
  0xf9   : > { %1554 = vmatpush2.bf16.msra.mxu0 %v3864_v46  ;;  %v3959_v46 = vld [vmem:[%s4740_s18 + $0x1ac] ss:$16 sps:$4 sm:$0xff]  }
  0xfa   : > { %1597 = vmatpush2.bf16.msra.mxu1 %v3865_v47  ;;  %1555 = vmatprep.subr.bf16.mxu0 %v3866_v48  ;;  %v3962_v47 = vld [vmem:[%s4740_s18 + $0x2ac] ss:$16 sps:$4 sm:$0xff]   ;;  %v3957_v48 = vld [vmem:[%s4740_s18 + $0x1a8] ss:$16 sps:$4 sm:$0xff]  }
  0xfb   : > { %1598 = vmatprep.subr.bf16.mxu1 %v3868_v50  ;;  %v3965_v50 = vld [vmem:[%s4740_s18 + $0x18c] ss:$16 sps:$4 sm:$0xff]  }
  0xfd   : > { %1556 = vmatpush2.bf16.msra.mxu0 %v3870_v52  ;;  %v3968_v52 = vld [vmem:[%s4740_s18 + $0x28c] ss:$16 sps:$4 sm:$0xff]  }
  0xfe   : > { %1599 = vmatpush2.bf16.msra.mxu1 %v3871_v53  ;;  %1557 = vmatprep.subr.bf16.mxu0 %v3872_v54  ;;  %v3963_v53 = vld [vmem:[%s4740_s18 + $0x188] ss:$16 sps:$4 sm:$0xff]  }
  0xff   : > { %1600 = vmatprep.subr.bf16.mxu1 %v3874_v55  ;;  %v3966_v54 = vld [vmem:[%s4740_s18 + $0x288] ss:$16 sps:$4 sm:$0xff]   ;;  %v3974_v55 = vld [vmem:[%s4740_s18 + $0x26c] ss:$16 sps:$4 sm:$0xff]  }
 0x101   : > { %1558 = vmatpush2.bf16.msra.mxu0 %v3876_v56  ;;  %v3969_v56 = vld [vmem:[%s4740_s18 + $0x168] ss:$16 sps:$4 sm:$0xff]  }
 0x102   : > { %1601 = vmatpush2.bf16.msra.mxu1 %v3877_v57  ;;  %1559 = vmatprep.subr.bf16.mxu0 %v3878_v58  ;;  %v3972_v57 = vld [vmem:[%s4740_s18 + $0x268] ss:$16 sps:$4 sm:$0xff]   ;;  %v3977_v58 = vld [vmem:[%s4740_s18 + $0x14c] ss:$16 sps:$4 sm:$0xff]  }
 0x103   : > { %1602 = vmatprep.subr.bf16.mxu1 %v3880_v59  ;;  %v3980_v59 = vld [vmem:[%s4740_s18 + $0x24c] ss:$16 sps:$4 sm:$0xff]  }
 0x105   : > { %1560 = vmatpush2.bf16.msra.mxu0 %v3882_v60  ;;  %v3975_v60 = vld [vmem:[%s4740_s18 + $0x148] ss:$16 sps:$4 sm:$0xff]  }
 0x106   : > { %1603 = vmatpush2.bf16.msra.mxu1 %v3883_v61  ;;  %1561 = vmatprep.subr.bf16.mxu0 %v3884_v62  ;;  %v3978_v61 = vld [vmem:[%s4740_s18 + $0x248] ss:$16 sps:$4 sm:$0xff]   ;;  %v3983_v62 = vld [vmem:[%s4740_s18 + $0x12c] ss:$16 sps:$4 sm:$0xff]  }
 0x107   : > { %1604 = vmatprep.subr.bf16.mxu1 %v3886_v63  ;;  %v3986_v63 = vld [vmem:[%s4740_s18 + $0x22c] ss:$16 sps:$4 sm:$0xff]  }
 0x109   : > { %1562 = vmatpush2.bf16.msra.mxu0 %v3888_v0  ;;  %v3981_v0 = vld [vmem:[%s4740_s18 + $0x128] ss:$16 sps:$4 sm:$0xff]  }
 0x10a   : > { %1605 = vmatpush2.bf16.msra.mxu1 %v3889_v1  ;;  %1617 = vmatprep.subr.bf16.mxu0 %v3898_v2  ;;  %v3984_v1 = vld [vmem:[%s4740_s18 + $0x228] ss:$16 sps:$4 sm:$0xff]   ;;  %v3989_v2 = vld [vmem:[%s4740_s18 + $0x10c] ss:$16 sps:$4 sm:$0xff]  }
 0x10b   : > { %1660 = vmatprep.subr.bf16.mxu1 %v3901_v3  ;;  %v3992_v3 = vld [vmem:[%s4740_s18 + $0x20c] ss:$16 sps:$4 sm:$0xff]  }
 0x10c   : > { %1564 = vmatmul.mubr.bf16.vlgmr.msra.gmra.mxu0 %v4827_v4 }
 0x10d   : > { %1607 = vmatmul.mubr.bf16.vlgmr.msra.gmra.mxu1 %v4829_v5  ;;  %1618 = vmatpush1.bf16.msra.mxu0 %v3896_v6  ;;  %v3987_v6 = vld [vmem:[%s4740_s18 + $0x108] ss:$16 sps:$4 sm:$0xff]  }
 0x10e   : > { %1661 = vmatpush1.bf16.msra.mxu1 %v3899_v7  ;;  %1619 = vmatprep.subr.bf16.mxu0 %v3904_v8  ;;  %v3990_v7 = vld [vmem:[%s4740_s18 + $0x208] ss:$16 sps:$4 sm:$0xff]   ;;  %v3995_v8 = vld [vmem:[%s4740_s18 + $0x3ec] ss:$16 sps:$4 sm:$0xff]  }
 0x10f   : > { %1662 = vmatprep.subr.bf16.mxu1 %v3907_v9  ;;  %1649 = vmatprep.mubr.bf16.mxu0 %v4421_v14  ;;  %v3998_v9 = vld [vmem:[%s4740_s18 + $0x4ec] ss:$16 sps:$4 sm:$0xff]  }
 0x110   : > { %1692 = vmatprep.mubr.bf16.mxu1 %v3892_v49  ;;  %v3960_v49 = vld [vmem:[%s4740_s18 + $0x2a8] ss:$16 sps:$4 sm:$0xff]  }
 0x111   : > { %1620 = vmatpush1.bf16.msra.mxu0 %v3902_v10  ;;  %v3993_v10 = vld [vmem:[%s4740_s18 + $0x3e8] ss:$16 sps:$4 sm:$0xff]  }
 0x112   : > { %1663 = vmatpush1.bf16.msra.mxu1 %v3905_v11  ;;  %1621 = vmatprep.subr.bf16.mxu0 %v3910_v12  ;;  %v3996_v11 = vld [vmem:[%s4740_s18 + $0x4e8] ss:$16 sps:$4 sm:$0xff]   ;;  %v4001_v12 = vld [vmem:[%s4740_s18 + $0x3cc] ss:$16 sps:$4 sm:$0xff]  }
 0x113   : > { %1664 = vmatprep.subr.bf16.mxu1 %v3913_v13  ;;  %v4004_v13 = vld [vmem:[%s4740_s18 + $0x4cc] ss:$16 sps:$4 sm:$0xff]  }
 0x115   : > { %1622 = vmatpush1.bf16.msra.mxu0 %v3908_v15  ;;  %v3999_v15 = vld [vmem:[%s4740_s18 + $0x3c8] ss:$16 sps:$4 sm:$0xff]  }
 0x116   : > { %1665 = vmatpush1.bf16.msra.mxu1 %v3911_v16  ;;  %1623 = vmatprep.subr.bf16.mxu0 %v3916_v17  ;;  %v4002_v16 = vld [vmem:[%s4740_s18 + $0x4c8] ss:$16 sps:$4 sm:$0xff]   ;;  %v4007_v17 = vld [vmem:[%s4740_s18 + $0x3ac] ss:$16 sps:$4 sm:$0xff]  }
 0x117   : > { %1666 = vmatprep.subr.bf16.mxu1 %v3919_v18  ;;  %v4010_v18 = vld [vmem:[%s4740_s18 + $0x4ac] ss:$16 sps:$4 sm:$0xff]  }
 0x119   : > { %1624 = vmatpush1.bf16.msra.mxu0 %v3914_v19  ;;  %v4005_v19 = vld [vmem:[%s4740_s18 + $0x3a8] ss:$16 sps:$4 sm:$0xff]  }
 0x11a   : > { %1667 = vmatpush1.bf16.msra.mxu1 %v3917_v20  ;;  %1625 = vmatprep.subr.bf16.mxu0 %v3922_v21  ;;  %v4013_v20 = vld [vmem:[%s4740_s18 + $0x38c] ss:$16 sps:$4 sm:$0xff]  }
 0x11b   : > { %1668 = vmatprep.subr.bf16.mxu1 %v3925_v22  ;;  %v4016_v21 = vld [vmem:[%s4740_s18 + $0x48c] ss:$16 sps:$4 sm:$0xff]   ;;  %v4011_v22 = vld [vmem:[%s4740_s18 + $0x388] ss:$16 sps:$4 sm:$0xff]  }
 0x11d   : > { %1626 = vmatpush1.bf16.msra.mxu0 %v3920_v23  ;;  %v4014_v23 = vld [vmem:[%s4740_s18 + $0x488] ss:$16 sps:$4 sm:$0xff]  }
 0x11e   : > { %1669 = vmatpush1.bf16.msra.mxu1 %v3923_v24  ;;  %1627 = vmatprep.subr.bf16.mxu0 %v3928_v25  ;;  %v4022_v24 = vld [vmem:[%s4740_s18 + $0x46c] ss:$16 sps:$4 sm:$0xff]   ;;  %v4017_v25 = vld [vmem:[%s4740_s18 + $0x368] ss:$16 sps:$4 sm:$0xff]  }
 0x11f   : > { %1670 = vmatprep.subr.bf16.mxu1 %v3931_v26  ;;  %v4020_v26 = vld [vmem:[%s4740_s18 + $0x468] ss:$16 sps:$4 sm:$0xff]  }
 0x121   : > { %1628 = vmatpush1.bf16.msra.mxu0 %v3926_v27  ;;  %v4025_v27 = vld [vmem:[%s4740_s18 + $0x34c] ss:$16 sps:$4 sm:$0xff]  }
 0x122   : > { %1671 = vmatpush1.bf16.msra.mxu1 %v3929_v28  ;;  %1629 = vmatprep.subr.bf16.mxu0 %v3934_v29  ;;  %v4028_v28 = vld [vmem:[%s4740_s18 + $0x44c] ss:$16 sps:$4 sm:$0xff]   ;;  %v4023_v29 = vld [vmem:[%s4740_s18 + $0x348] ss:$16 sps:$4 sm:$0xff]  }
 0x123   : > { %1672 = vmatprep.subr.bf16.mxu1 %v3937_v30  ;;  %v4026_v30 = vld [vmem:[%s4740_s18 + $0x448] ss:$16 sps:$4 sm:$0xff]  }
 0x125   : > { %1630 = vmatpush1.bf16.msra.mxu0 %v3932_v31  ;;  %v4031_v31 = vld [vmem:[%s4740_s18 + $0x32c] ss:$16 sps:$4 sm:$0xff]  }
 0x126   : > { %1673 = vmatpush1.bf16.msra.mxu1 %v3935_v32  ;;  %1631 = vmatprep.subr.bf16.mxu0 %v3940_v33  ;;  %v4034_v32 = vld [vmem:[%s4740_s18 + $0x42c] ss:$16 sps:$4 sm:$0xff]   ;;  %v4029_v33 = vld [vmem:[%s4740_s18 + $0x328] ss:$16 sps:$4 sm:$0xff]  }
 0x127   : > { %1674 = vmatprep.subr.bf16.mxu1 %v3943_v34  ;;  %v4032_v34 = vld [vmem:[%s4740_s18 + $0x428] ss:$16 sps:$4 sm:$0xff]  }
 0x129   : > { %1632 = vmatpush1.bf16.msra.mxu0 %v3938_v35  ;;  %v4037_v35 = vld [vmem:[%s4740_s18 + $0x30c] ss:$16 sps:$4 sm:$0xff]  }
 0x12a   : > { %1675 = vmatpush1.bf16.msra.mxu1 %v3941_v36  ;;  %1703 = vmatprep.subr.bf16.mxu0 %v3950_v38  ;;  %v4040_v36 = vld [vmem:[%s4740_s18 + $0x40c] ss:$16 sps:$4 sm:$0xff]   ;;  %v4038_v38 = vld [vmem:[%s4740_s18 + $0x408] ss:$16 sps:$4 sm:$0xff]  }
 0x12b   : > { %1676 = vmatprep.subr.bf16.mxu1 %v3947_v37  ;;  %v4035_v37 = vld [vmem:[%s4740_s18 + $0x308] ss:$16 sps:$4 sm:$0xff]  }
 0x12c   : > { %1650 = vmatmul.mubr.bf16.vlgmr.msra.gmra.mxu0 %v4866_v39 }
 0x12d   : > { %1704 = vmatpush1.bf16.msra.mxu0 %v3948_v41  ;;  %1735 = vmatprep.mubr.bf16.mxu0 %v4808_v51  ;;  %v3971_v51 = vld [vmem:[%s4740_s18 + $0x16c] ss:$16 sps:$4 sm:$0xff]  }
 0x12e   : > { %1677 = vmatpush2.bf16.msra.mxu1 %v3945_v40  ;;  %1705 = vmatprep.subr.bf16.mxu0 %v3956_v43 }
 0x12f   : > { %1678 = vmatprep.subr.bf16.mxu1 %v3953_v42 }
 0x131   : > { %1706 = vmatpush1.bf16.msra.mxu0 %v3954_v45 }
 0x132   : > { %1679 = vmatpush2.bf16.msra.mxu1 %v3951_v44  ;;  %1707 = vmatprep.subr.bf16.mxu0 %v3962_v47 }
 0x133   : > { %1680 = vmatprep.subr.bf16.mxu1 %v3959_v46 }
 0x135   : > { %1708 = vmatpush1.bf16.msra.mxu0 %v3960_v49 }
 0x136   : > { %1681 = vmatpush2.bf16.msra.mxu1 %v3957_v48  ;;  %1709 = vmatprep.subr.bf16.mxu0 %v3968_v52 }
 0x137   : > { %1682 = vmatprep.subr.bf16.mxu1 %v3965_v50 }
 0x139   : > { %1710 = vmatpush1.bf16.msra.mxu0 %v3966_v54 }
 0x13a   : > { %1683 = vmatpush2.bf16.msra.mxu1 %v3963_v53  ;;  %1711 = vmatprep.subr.bf16.mxu0 %v3974_v55 }
 0x13b   : > { %1684 = vmatprep.subr.bf16.mxu1 %v3971_v51 }
 0x13d   : > { %1712 = vmatpush1.bf16.msra.mxu0 %v3972_v57 }
 0x13e   : > { %1685 = vmatpush2.bf16.msra.mxu1 %v3969_v56  ;;  %1713 = vmatprep.subr.bf16.mxu0 %v3980_v59 }
 0x13f   : > { %1686 = vmatprep.subr.bf16.mxu1 %v3977_v58 }
 0x141   : > { %1714 = vmatpush1.bf16.msra.mxu0 %v3978_v61 }
 0x142   : > { %1687 = vmatpush2.bf16.msra.mxu1 %v3975_v60  ;;  %1715 = vmatprep.subr.bf16.mxu0 %v3986_v63 }
 0x143   : > { %1688 = vmatprep.subr.bf16.mxu1 %v3983_v62 }
 0x145   : > { %1716 = vmatpush1.bf16.msra.mxu0 %v3984_v1 }
 0x146   : > { %1689 = vmatpush2.bf16.msra.mxu1 %v3981_v0  ;;  %1717 = vmatprep.subr.bf16.mxu0 %v3992_v3 }
 0x147   : > { %1690 = vmatprep.subr.bf16.mxu1 %v3989_v2 }
 0x149   : > { %1718 = vmatpush1.bf16.msra.mxu0 %v3990_v7 }
 0x14a   : > { %1691 = vmatpush2.bf16.msra.mxu1 %v3987_v6  ;;  %1719 = vmatprep.subr.bf16.mxu0 %v3995_v8 }
 0x14b   : > { %1746 = vmatprep.subr.bf16.mxu1 %v3998_v9 }
 0x14d   : > { %1693 = vmatmul.mubr.bf16.vlgmr.msra.gmra.mxu1 %v4827_v4  ;;  %1720 = vmatpush2.bf16.msra.mxu0 %v3993_v10  ;;  %v4008_v4 = vld [vmem:[%s4740_s18 + $0x4a8] ss:$16 sps:$4 sm:$0xff]  }
 0x14e   : > { %1747 = vmatpush1.bf16.msra.mxu1 %v3996_v11  ;;  %1721 = vmatprep.subr.bf16.mxu0 %v4001_v12 }
 0x14f   : > { %1748 = vmatprep.subr.bf16.mxu1 %v4004_v13  ;;  %1778 = vmatprep.mubr.bf16.mxu1 %v4421_v14  ;;  %v4019_v14 = vld [vmem:[%s4740_s18 + $0x36c] ss:$16 sps:$4 sm:$0xff]  }
 0x151   : > { %1722 = vmatpush2.bf16.msra.mxu0 %v3999_v15 }
 0x152   : > { %1749 = vmatpush1.bf16.msra.mxu1 %v4002_v16  ;;  %1723 = vmatprep.subr.bf16.mxu0 %v4007_v17  ;;  %v4422_v17 = vmov 683565275  }
 0x153   : > { %1750 = vmatprep.subr.bf16.mxu1 %v4010_v18 }
 0x155   : > { %1724 = vmatpush2.bf16.msra.mxu0 %v4005_v19  ;;  %v4423_v19 = vmov 2475754826  }
 0x156   : > { %1751 = vmatpush1.bf16.msra.mxu1 %v4008_v4  ;;  %1725 = vmatprep.subr.bf16.mxu0 %v4013_v20  ;;  %v4424_v20 = vmov 2131351028  }
 0x157   : > { %1752 = vmatprep.subr.bf16.mxu1 %v4016_v21 }
 0x159   : > { %1726 = vmatpush2.bf16.msra.mxu0 %v4011_v22  ;;  %v4425_v22 = vmov 2102212464  }
 0x15a   : > { %1753 = vmatpush1.bf16.msra.mxu1 %v4014_v23  ;;  %1727 = vmatprep.subr.bf16.mxu0 %v4019_v14 }
 0x15b   : > { %1754 = vmatprep.subr.bf16.mxu1 %v4022_v24 }
 0x15d   : > { %1728 = vmatpush2.bf16.msra.mxu0 %v4017_v25 }
 0x15e   : > { %1755 = vmatpush1.bf16.msra.mxu1 %v4020_v26  ;;  %1729 = vmatprep.subr.bf16.mxu0 %v4025_v27  ;;  %v4426_v26 = vmov 920167782  }
 0x15f   : > { %1756 = vmatprep.subr.bf16.mxu1 %v4028_v28 }
 0x161   : > { %1730 = vmatpush2.bf16.msra.mxu0 %v4023_v29 }
 0x162   : > { %1757 = vmatpush1.bf16.msra.mxu1 %v4026_v30  ;;  %1731 = vmatprep.subr.bf16.mxu0 %v4031_v31  ;;  %v4427_v30 = vmov 1326507024  }
 0x163   : > { %1758 = vmatprep.subr.bf16.mxu1 %v4034_v32 }
 0x165   : > { %1732 = vmatpush2.bf16.msra.mxu0 %v4029_v33 }
 0x166   : > { %1759 = vmatpush1.bf16.msra.mxu1 %v4032_v34  ;;  %1733 = vmatprep.subr.bf16.mxu0 %v4037_v35 }
 0x167   : > { %1760 = vmatprep.subr.bf16.mxu1 %v4040_v36 }
 0x169   : > { %1734 = vmatpush2.bf16.msra.mxu0 %v4035_v37 }
 0x16a   : > { %1761 = vmatpush1.bf16.msra.mxu1 %v4038_v38 }
 0x16c   : > { %1736 = vmatmul.mubr.bf16.vlgmr.msra.gmra.mxu0 %v4829_v5 }
 0x16d   : > { %1779 = vmatmul.mubr.bf16.vlgmr.msra.gmra.mxu1 %v4866_v39 }
 0x1cc   : > { %v1565_v40 = vpop.f32.mrf.mxu0 }
 0x1cd   : > { %v1608_v41 = vpop.f32.mrf.mxu1 }
 0x1ce   : > { %v1609_v42 = vadd.f32 %v1608_v41, %v1565_v40  ;;  %v1567_v43 = vpop.f32.mrf.mxu0 }
 0x1cf   : > { %v1610_v44 = vpop.f32.mrf.mxu1 }
 0x1d0   : > { %v1611_v45 = vadd.f32 %v1610_v44, %v1567_v43  ;;  %v1569_v46 = vpop.f32.mrf.mxu0 }
 0x1d1   : > { %v1612_v48 = vpop.f32.mrf.mxu1 }
 0x1d2   : > { %v1571_v47 = vpop.f32.mrf.mxu0  ;;  %v1613_v53 = vadd.f32 %v1612_v48, %v1569_v46 }
 0x1d3   : > { %v1614_v54 = vpop.f32.mrf.mxu1 }
 0x1d4   : > { %v1615_v39 = vadd.f32 %v1614_v54, %v1571_v47 }
 0x1ec   : > { %v1651_v49 = vpop.f32.mrf.mxu0 }
 0x1ed   : > { %v4936_v50 = vadd.f32 %v1651_v49, %v1609_v42 }
 0x1ee   : > { %v1653_v52 = vpop.f32.mrf.mxu0 }
 0x1ef   : > { %v4938_v51 = vadd.f32 %v1653_v52, %v1611_v45 }
 0x1f0   : > { %v1655_v5 = vpop.f32.mrf.mxu0 }
 0x1f1   : > { %v4940_v55 = vadd.f32 %v1655_v5, %v1613_v53 }
 0x1f2   : > { %v1657_v56 = vpop.f32.mrf.mxu0 }
 0x1f3   : > { %v1805_v57 = vand.u32 2147483647, %v4940_v55  ;;  %v1808_v58 = vand.u32 2139095040, %v4940_v55  ;;  %v4944_v59 = vadd.f32 %v1657_v56, %v1615_v39  ;;  %vm1807_vm14 = vcmp.lt.s32.totalorder %v4940_v55, 0 }
 0x1f5   : > { %v1809_v60 = vshrl.u32 %v1808_v58, 23  ;;  %v1911_v61 = vand.u32 2139095040, %v4944_v59  ;;  %v1812_v63 = vand.u32 8388607, %v1805_v57  ;;  %v1908_v0 = vand.u32 2147483647, %v4944_v59 }
 0x1f6   : > { %vm5042_vm15 = vcmp.le.f32.partialorder %v1805_v57, 0.7853982 }
 0x1f7   : > { %v3614_v62 = vadd.s32 4294967169, %v1809_v60  ;;  %v1912_v1 = vshrl.u32 %v1911_v61, 23  ;;  %v1813_v6 = vor.u32 8388608, %v1812_v63  ;;  %v1915_v7 = vand.u32 8388607, %v1908_v0 }
 0x1f9   : > { %v1815_v2 = vadd.s32 1, %v3614_v62  ;;  %v3618_v3 = vadd.s32 4294967169, %v1912_v1  ;;  %v4952_v13 = vshll.u32 %v1813_v6, 8  ;;  %v1916_v15 = vor.u32 8388608, %v1915_v7 }
 0x1fb   : > { %vm1816_vm0 = vcmp.gt.s32.totalorder %v1815_v2, 0  ;;  %v1918_v8 = vadd.s32 1, %v3618_v3  ;;  %v1956_v49 = vshll.u32 %v1916_v15, 8 }
 0x1fc   : > { %v1817_v9 = vsel %vm1816_vm0, %v1815_v2, 0  ;;  %vm1910_vm0 = vcmp.lt.s32.totalorder %v4944_v59, 0 }
 0x1fd   : > { %v1819_v10 = vand.u32 31, %v1817_v9  ;;  %vm1919_vm1 = vcmp.gt.s32.totalorder %v1918_v8, 0  ;;  %v1818_v11 = vshrl.u32 %v1817_v9, 5 }
 0x1fe   : > { %v1920_v16 = vsel %vm1919_vm1, %v1918_v8, 0  ;;  %vm1909_vm1 = vcmp.le.f32.partialorder %v1908_v0, 0.7853982 }
 0x1ff   : > { %v1820_v12 = vsub.s32 32, %v1819_v10  ;;  %v1822_v18 = vshll.u32 %v4422_v17, %v1819_v10  ;;  %v1825_v4 = vshll.u32 %v4423_v19, %v1819_v10  ;;  %v1828_v21 = vshll.u32 %v4424_v20, %v1819_v10 }
 0x200   : > { %v1831_v23 = vshll.u32 %v4425_v22, %v1819_v10  ;;  %v1834_v27 = vshll.u32 %v4426_v26, %v1819_v10  ;;  %vm1837_vm2 = vcmp.lt.s32.totalorder %v1818_v11, 1  ;;  %vm1839_vm3 = vcmp.lt.s32.totalorder %v1818_v11, 3 }
 0x201   : > { %v1823_v14 = vshrl.u32 %v4423_v19, %v1820_v12  ;;  %v1826_v24 = vshrl.u32 %v4424_v20, %v1820_v12  ;;  %v1829_v25 = vshrl.u32 %v4425_v22, %v1820_v12  ;;  %v1821_v28 = vshrl.u32 %v4422_v17, %v1820_v12 }
 0x202   : > { %v1832_v29 = vshrl.u32 %v4426_v26, %v1820_v12  ;;  %v1835_v31 = vshrl.u32 %v4427_v30, %v1820_v12  ;;  %vm1840_vm4 = vcmp.lt.s32.totalorder %v1818_v11, 4  ;;  %v4965_v37 = vshrl.u32 %v1920_v16, 5 }
 0x203   : > { %v1824_v32 = vor.u32 %v1823_v14, %v1822_v18  ;;  %v1827_v33 = vor.u32 %v1826_v24, %v1825_v4  ;;  %v1830_v34 = vor.u32 %v1829_v25, %v1828_v21  ;;  %v1922_v46 = vand.u32 31, %v1920_v16 }
 0x204   : > { %v1833_v35 = vor.u32 %v1832_v29, %v1831_v23  ;;  %v1836_v36 = vor.u32 %v1835_v31, %v1834_v27  ;;  %vm1838_vm5 = vcmp.lt.s32.totalorder %v1818_v11, 2  ;;  %vm1940_vm6 = vcmp.lt.s32.totalorder %v4965_v37, 1 }
 0x205   : > { %v1841_v38 = vsel %vm1837_vm2, %v1821_v28, %v1824_v32  ;;  %v1842_v40 = vsel %vm1840_vm4, %v1830_v34, 2102212464  ;;  %v1845_v41 = vsel %vm1837_vm2, %v1824_v32, %v1827_v33  ;;  %v1849_v42 = vsel %vm1837_vm2, %v1827_v33, %v1830_v34 }
 0x206   : > { %v1843_v43 = vsel %vm1839_vm3, %v1827_v33, %v1842_v40  ;;  %v1846_v44 = vsel %vm1840_vm4, %v1833_v35, 920167782  ;;  %v1850_v45 = vsel %vm1840_vm4, %v1836_v36, 1326507024  ;;  %v1923_v5 = vsub.s32 32, %v1922_v46 }
 0x207   : > { %v1847_v47 = vsel %vm1839_vm3, %v1830_v34, %v1846_v44  ;;  %v1851_v48 = vsel %vm1839_vm3, %v1833_v35, %v1850_v45  ;;  %v1844_v52 = vsel %vm1838_vm5, %v1841_v38, %v1843_v43  ;;  %v1925_v61 = vshll.u32 %v4422_v17, %v1922_v46 }
 0x208   : > { %v1848_v53 = vsel %vm1838_vm5, %v1845_v41, %v1847_v47  ;;  %v1852_v54 = vsel %vm1838_vm5, %v1849_v42, %v1851_v48  ;;  %v1926_v62 = vshrl.u32 %v4423_v19, %v1923_v5  ;;  %v1928_v63 = vshll.u32 %v4423_v19, %v1922_v46 }
 0x209   : > { %v4968_v39 = vmul.u32.u64.low %v4952_v13, %v1852_v54  ;;  %v4969_v56 = vmul.u32.u64.high %v4952_v13, %v1852_v54, %v4968_v39  ;;  %v4972_v58 = vmul.u32.u64.low %v4952_v13, %v1848_v53  ;;  %v4973_v60 = vmul.u32.u64.high %v4952_v13, %v1848_v53, %v4972_v58 }
 0x20a   : > { %v1929_v1 = vshrl.u32 %v4424_v20, %v1923_v5  ;;  %v1931_v2 = vshll.u32 %v4424_v20, %v1922_v46  ;;  %v1932_v3 = vshrl.u32 %v4425_v22, %v1923_v5  ;;  %v1934_v6 = vshll.u32 %v4425_v22, %v1922_v46 }
 0x20b   : > { %v1927_v7 = vor.u32 %v1926_v62, %v1925_v61  ;;  %v1935_v8 = vshrl.u32 %v4426_v26, %v1923_v5  ;;  %v1937_v9 = vshll.u32 %v4426_v26, %v1922_v46  ;;  %v1938_v10 = vshrl.u32 %v4427_v30, %v1923_v5 }
 0x20c   : > { %v1860_v11 = vmul.u32 %v4952_v13, %v1844_v52  ;;  %vm1862_vm7 = vc.u32 %v4969_v56, %v4972_v58  ;;  %v1863_v12 = vadd.s32 1, %v4973_v60  ;;  %v1930_v15 = vor.u32 %v1929_v1, %v1928_v63 }
 0x20d   : > { %v1924_v16 = vshrl.u32 %v4422_v17, %v1923_v5  ;;  %v1933_v18 = vor.u32 %v1932_v3, %v1931_v2  ;;  %v1936_v4 = vor.u32 %v1935_v8, %v1934_v6  ;;  %v1939_v21 = vor.u32 %v1938_v10, %v1937_v9 }
 0x20e   : > { %v1864_v23 = vsel %vm1862_vm7, %v1863_v12, %v4973_v60  ;;  %vm1941_vm8 = vcmp.lt.s32.totalorder %v4965_v37, 2  ;;  %vm1942_vm9 = vcmp.lt.s32.totalorder %v4965_v37, 3  ;;  %vm1943_vm10 = vcmp.lt.s32.totalorder %v4965_v37, 4  ;;  %v1694_v60 = vpop.f32.mrf.mxu1 }
 0x20f   : > { %v1865_v13 = vadd.s32 %v1864_v23, %v1860_v11  ;;  %v1945_v14 = vsel %vm1943_vm10, %v1933_v18, 2102212464  ;;  %v1948_v24 = vsel %vm1940_vm6, %v1927_v7, %v1930_v15  ;;  %v1949_v25 = vsel %vm1943_vm10, %v1936_v4, 920167782 }
 0x210   : > { %v1944_v27 = vsel %vm1940_vm6, %v1924_v16, %v1927_v7  ;;  %v1950_v28 = vsel %vm1942_vm9, %v1933_v18, %v1949_v25  ;;  %v1952_v29 = vsel %vm1940_vm6, %v1930_v15, %v1933_v18  ;;  %v1953_v31 = vsel %vm1943_vm10, %v1939_v21, 1326507024  ;;  %v1696_v2 = vpop.f32.mrf.mxu1 }
 0x211   : > { %v1866_v32 = vadd.s32 536870912, %v1865_v13  ;;  %v1946_v33 = vsel %vm1942_vm9, %v1930_v15, %v1945_v14  ;;  %v1951_v34 = vsel %vm1941_vm8, %v1948_v24, %v1950_v28  ;;  %v1954_v35 = vsel %vm1942_vm9, %v1936_v4, %v1953_v31 }
 0x212   : > { %v1955_v36 = vsel %vm1941_vm8, %v1952_v29, %v1954_v35  ;;  %v5006_v38 = vmul.u32.u64.low %v1956_v49, %v1951_v34  ;;  %v5007_v40 = vmul.u32.u64.high %v1956_v49, %v1951_v34, %v5006_v38  ;;  %v1947_v44 = vsel %vm1941_vm8, %v1944_v27, %v1946_v33  ;;  %v1698_v15 = vpop.f32.mrf.mxu1 }
 0x213   : > { %v5010_v41 = vshrl.u32 %v1866_v32, 30  ;;  %v5012_v42 = vmul.u32.u64.low %v1956_v49, %v1955_v36  ;;  %v5013_v43 = vmul.u32.u64.high %v1956_v49, %v1955_v36, %v5012_v42  ;;  %v1963_v48 = vmul.u32 %v1956_v49, %v1947_v44 }
 0x214   : > { %v1966_v46 = vadd.s32 1, %v5007_v40  ;;  %v1789_v37 = vand.u32 2147483647, %v4936_v50  ;;  %v1790_v1 = vand.u32 2147483647, %v4938_v51  ;;  %v1861_v8 = vadd.s32 %v4972_v58, %v4969_v56  ;;  %v1700_v27 = vpop.f32.mrf.mxu1 }
 0x215   : > { %v1868_v45 = vshll.u32 %v5010_v41, 30  ;;  %vm1965_vm11 = vc.u32 %v5013_v43, %v5006_v38  ;;  %v4428_v28 = vmov 1983009808   ;;  %v2766_v31 = vlaneseq }
 0x216   : > { %v1967_v52 = vsel %vm1965_vm11, %v1966_v46, %v5007_v40  ;;  %v1793_v7 = vsub.f32 0.0, %v1789_v37  ;;  %v1794_v11 = vsub.f32 0.0, %v1790_v1  ;;  %v2764_v29 = vunpack.c.l.s4 %v4428_v28 }
 0x217   : > { %v1869_v47 = vsub.s32 %v1865_v13, %v1868_v45  ;;  %v1968_v54 = vadd.s32 %v1967_v52, %v1963_v48  ;;  %v2767_v44 = vshrl.u32 %v2766_v31, 7  ;;  %v5081_v31 = vld [vmem:[%s5059_s25 + $0x8] sm:$0xff]  ;;  %vm1897_vm2 = vweird.f32 %v4940_v55 }
 0x218   : > { %v1797_v23 = vmul.f32 1.442695, %v1793_v7  ;;  %v1799_v24 = vmul.f32 1.442695, %v1794_v11  ;;  %v2765_v42 = vunpack.c.0.s8 %v2764_v29 }
 0x219   : > { %v1871_v53 = vsub.s32 0, %v1869_v47  ;;  %v1969_v39 = vadd.s32 536870912, %v1968_v54 }
 0x21a   : > { %4051 = vpow2.f32 %v1797_v23 }
 0x21b   : > { %v3615_v5 = vmin.u32 %v1871_v53, %v1869_v47  ;;  %v5022_v62 = vshrl.u32 %v1969_v39, 30  ;;  %4053 = vpow2.f32 %v1799_v24  ;;  %v1964_v53 = vadd.s32 %v5006_v38, %v5013_v43 }
 0x21d   : > { %v1873_v61 = vclz %v3615_v5  ;;  %v1971_v49 = vshll.u32 %v5022_v62, 30 }
 0x21f   : > { %v3616_v63 = vadd.s32 4294967294, %v1873_v61  ;;  %v1972_v6 = vsub.s32 %v1968_v54, %v1971_v49  ;;  %v1891_v61 = vsub.s32 4, %v5010_v41 }
 0x221   : > { %vm3617_vm12 = vcmp.lt.s32.totalorder %v3616_v63, 0  ;;  %v1974_v12 = vsub.s32 0, %v1972_v6  ;;  %v1892_v57 = vsel %vm1807_vm14, %v1891_v61, %v5010_v41 }
 0x222   : > { %v1876_v3 = vsel %vm3617_vm12, 0, %v3616_v63 }
 0x223   : > { %v1877_v9 = vsub.s32 32, %v1876_v3  ;;  %v1881_v10 = vsub.s32 4294967266, %v1876_v3  ;;  %v1878_v16 = vshll.u32 %v1869_v47, %v1876_v3  ;;  %v3619_v21 = vmin.u32 %v1974_v12, %v1972_v6 }
 0x225   : > { %v1879_v18 = vshrl.u32 %v1861_v8, %v1877_v9  ;;  %v1882_v4 = vadd.s32 127, %v1881_v10  ;;  %v1976_v25 = vclz %v3619_v21  ;;  %v5048_v8 = vsub.s32 %v2765_v42, %v2767_v44 }
 0x226   : > { %v1894_v21 = vsel %vm5042_vm15, 0, %v1892_v57 }
 0x227   : > { %v1880_v13 = vor.u32 %v1879_v18, %v1878_v16  ;;  %v1883_v14 = vshll.u32 %v1882_v4, 23  ;;  %v3620_v58 = vadd.s32 4294967294, %v1976_v25  ;;  %v1994_v18 = vsub.s32 4, %v5022_v62 }
 0x228   : > { %v5095_v42 = vrot.slane %v5081_v31, %v5048_v8  ;;  %v1898_v44 = vand.u32 3, %v1894_v21 }
 0x229   : > { %v1884_v56 = vor.u32 4788187, %v1883_v14  ;;  %v1887_v35 = vcvt.s32.f32 %v1880_v13  ;;  %vm3621_vm13 = vcmp.lt.s32.totalorder %v3620_v58, 0  ;;  %v1995_v29 = vsel %vm1910_vm0, %v1994_v18, %v5022_v62 }
 0x22a   : > { %v1979_v46 = vsel %vm3621_vm13, 0, %v3620_v58  ;;  %v2310_v58 = vadd.s32 3, %v1894_v21  ;;  %vm1899_vm4 = vcmp.lt.s32.totalorder %v1898_v44, 2  ;;  %vm1900_vm5 = vcmp.eq.s32.totalorder %v1898_v44, 0 }
 0x22b   : > { %v1885_v34 = vand.u32 2147483647, %v1884_v56  ;;  %v1980_v54 = vsub.s32 32, %v1979_v46  ;;  %v1984_v5 = vsub.s32 4294967266, %v1979_v46  ;;  %v1981_v63 = vshll.u32 %v1972_v6, %v1979_v46 }
 0x22c   : > { %v1737_v32 = vpop.f32.mrf.mxu0  ;;  %vm1903_vm6 = vcmp.eq.s32.totalorder %v1898_v44, 2  ;;  %vm2000_vm13 = vweird.f32 %v4944_v59 }
 0x22d   : > { %v1780_v33 = vpop.f32.mrf.mxu1  ;;  %v1738_v36 = vadd.f32 %v1737_v32, %v1694_v60  ;;  %v1888_v45 = vmul.f32 %v1887_v35, %v1885_v34  ;;  %v1982_v1 = vshrl.u32 %v1964_v53, %v1980_v54  ;;  %v1985_v49 = vadd.s32 127, %v1984_v5 }
 0x22e   : > { %v1739_v40 = vpop.f32.mrf.mxu0 }
 0x22f   : > { %v5032_v47 = vadd.f32 %v1780_v33, %v1738_v36  ;;  %v1740_v48 = vadd.f32 %v1739_v40, %v1696_v2  ;;  %v1782_v52 = vpop.f32.mrf.mxu1  ;;  %v1889_v60 = vxor.u32 2147483648, %v1888_v45  ;;  %v1983_v9 = vor.u32 %v1982_v1, %v1981_v63 }
 0x230   : > { %v1741_v39 = vpop.f32.mrf.mxu0  ;;  %v1986_v10 = vshll.u32 %v1985_v49, 23  ;;  %v1997_v36 = vsel %vm1909_vm1, 0, %v1995_v29 }
 0x231   : > { %v5038_v37 = vadd.f32 %v1782_v52, %v1740_v48  ;;  %v1742_v3 = vadd.f32 %v1741_v39, %v1698_v15  ;;  %v1890_v43 = vsel %vm1807_vm14, %v1889_v60, %v1888_v45  ;;  %v1784_v7 = vpop.f32.mrf.mxu1  ;;  %v5062_v15 = vld [vmem:[%s5059_s25] sm:$0xff]  ;;  %v1990_v13 = vcvt.s32.f32 %v1983_v9 }
 0x232   : > { %v1743_v2 = vpop.f32.mrf.mxu0  ;;  %v1893_v6 = vsel %vm5042_vm15, %v4940_v55, %v1890_v43  ;;  %v1987_v16 = vor.u32 4788187, %v1986_v10  ;;  %v5070_v14 = vrot.slane %v5062_v15, %v5048_v8  ;;  %v2311_v48 = vand.u32 3, %v2310_v58 }
 0x233   : > { %v5053_v11 = vadd.f32 %v1784_v7, %v1742_v3  ;;  %4055 = vcosq.f32 %v1893_v6  ;;  %v1744_v12 = vadd.f32 %v1743_v2, %v1700_v27  ;;  %v1786_v41 = vpop.f32.mrf.mxu1  ;;  %v5075_v27 = vpop.eup %4051  ;;  %v2414_v54 = vadd.s32 3, %v1997_v36 }
 0x234   : > { %4057 = vsinq.f32 %v1893_v6  ;;  %v1988_v23 = vand.u32 2147483647, %v1987_v16  ;;  %v5083_v56 = vpop.eup %4053  ;;  %v5090_v35 = vcombine.low %v5070_v14, %v5070_v14  ;;  %v2633_v45 = vmul.f32 2.0, %v5075_v27 }
 0x235   : > { %v2014_v4 = vand.u32 2139095040, %v5053_v11  ;;  %v5073_v25 = vadd.f32 %v1786_v41, %v1744_v12  ;;  %v5763_v34 = vand.u32 2147483647, %v5053_v11  ;;  %v5100_v0 = vmul.f32 %v5075_v27, %v5075_v27 }
 0x236   : > { %v1991_v28 = vmul.f32 %v1990_v13, %v1988_v23  ;;  %v5107_v53 = vmul.f32 2.0, %v5083_v56  ;;  %v5114_v49 = vmul.f32 %v5083_v56, %v5083_v56  ;;  %vm2312_vm7 = vcmp.lt.s32.totalorder %v2311_v48, 2 }
 0x237   : > { %v2015_v24 = vshrl.u32 %v2014_v4, 23  ;;  %v2117_v62 = vand.u32 2139095040, %v5073_v25  ;;  %v2018_v5 = vand.u32 8388607, %v5763_v34  ;;  %v5762_v61 = vand.u32 2147483647, %v5073_v25 }
 0x238   : > { %v1992_v33 = vxor.u32 2147483648, %v1991_v28  ;;  %v5116_v38 = vand.u32 3, %v1997_v36  ;;  %vm2313_vm8 = vcmp.eq.s32.totalorder %v2311_v48, 0  ;;  %vm2316_vm9 = vcmp.eq.s32.totalorder %v2311_v48, 2 }
 0x239   : > { %v3622_v32 = vadd.s32 4294967169, %v2015_v24  ;;  %v2118_v63 = vshrl.u32 %v2117_v62, 23  ;;  %v5118_v6 = vand.u32 3, %v2414_v54  ;;  %v2019_v10 = vor.u32 8388608, %v2018_v5 }
 0x23a   : > { %v1993_v46 = vsel %vm1910_vm0, %v1992_v33, %v1991_v28  ;;  %v5122_v12 = vand.u32 8388607, %v5762_v61  ;;  %vm2006_vm10 = vcmp.eq.s32.totalorder %v5116_v38, 2  ;;  %vm2003_vm11 = vcmp.eq.s32.totalorder %v5116_v38, 0 }
 0x23b   : > { %v2021_v40 = vadd.s32 1, %v3622_v32  ;;  %v1996_v52 = vsel %vm1909_vm1, %v4944_v59, %v1993_v46  ;;  %v3626_v57 = vadd.s32 4294967169, %v2118_v63  ;;  %vm2002_vm12 = vcmp.lt.s32.totalorder %v5116_v38, 2 }
 0x23c   : > { %4059 = vcosq.f32 %v1996_v52  ;;  %vm2417_vm14 = vcmp.eq.s32.totalorder %v5118_v6, 0  ;;  %vm2420_vm15 = vcmp.eq.s32.totalorder %v5118_v6, 2  ;;  %v5145_v63 = vshll.u32 %v2019_v10, 8 }
 0x23d   : > { %vm2022_vm3 = vcmp.gt.s32.totalorder %v2021_v40, 0  ;;  %4061 = vsinq.f32 %v1996_v52  ;;  %v2122_v48 = vor.u32 8388608, %v5122_v12 }
 0x23e   : > { %v2023_v39 = vsel %vm2022_vm3, %v2021_v40, 0  ;;  %vm2416_vm3 = vcmp.lt.s32.totalorder %v5118_v6, 2 }
 0x23f   : > { %v2025_v60 = vand.u32 31, %v2023_v39  ;;  %v2024_v29 = vshrl.u32 %v2023_v39, 5 }
 0x240   : > { %v4056_v1 = vpop.eup %4055 }
 0x241   : > { %v4058_v3 = vpop.eup %4057  ;;  %v1904_v2 = vxor.u32 2147483648, %v4056_v1  ;;  %v2026_v43 = vsub.s32 32, %v2025_v60  ;;  %v2034_v58 = vshll.u32 %v4424_v20, %v2025_v60  ;;  %v2037_v32 = vshll.u32 %v4425_v22, %v2025_v60 }
 0x242   : > { %v1901_v7 = vxor.u32 2147483648, %v4058_v3  ;;  %v2028_v36 = vshll.u32 %v4422_v17, %v2025_v60  ;;  %v2031_v40 = vshll.u32 %v4423_v19, %v2025_v60  ;;  %v2040_v62 = vshll.u32 %v4426_v26, %v2025_v60 }
 0x243   : > { %v1905_v9 = vsel %vm1903_vm6, %v1904_v2, %v4058_v3  ;;  %v2318_v18 = vsel %vm2316_vm9, %v1904_v2, %v4058_v3  ;;  %v2029_v4 = vshrl.u32 %v4423_v19, %v2026_v43  ;;  %v2035_v21 = vshrl.u32 %v4425_v22, %v2026_v43 }
 0x244   : > { %v1902_v16 = vsel %vm1900_vm5, %v4056_v1, %v1901_v7  ;;  %v2315_v13 = vsel %vm2313_vm8, %v4056_v1, %v1901_v7  ;;  %v2032_v41 = vshrl.u32 %v4424_v20, %v2026_v43  ;;  %v2038_v24 = vshrl.u32 %v4426_v26, %v2026_v43 }
 0x245   : > { %v1906_v23 = vsel %vm1899_vm4, %v1902_v16, %v1905_v9  ;;  %v2319_v44 = vsel %vm2312_vm7, %v2315_v13, %v2318_v18  ;;  %v2036_v46 = vor.u32 %v2035_v21, %v2034_v58  ;;  %v2041_v54 = vshrl.u32 %v4427_v30, %v2026_v43 }
 0x246   : > { %v1907_v28 = vsel %vm1897_vm2, nan, %v1906_v23  ;;  %v2039_v52 = vor.u32 %v2038_v24, %v2037_v32  ;;  %v2033_v39 = vor.u32 %v2032_v41, %v2031_v40  ;;  %vm2046_vm0 = vcmp.lt.s32.totalorder %v2024_v29, 4 }
 0x247   : > { %v2637_v33 = vmul.f32 %v2633_v45, %v1907_v28  ;;  %v2030_v45 = vor.u32 %v2029_v4, %v2028_v36  ;;  %v2042_v1 = vor.u32 %v2041_v54, %v2040_v62  ;;  %v2124_v60 = vadd.s32 1, %v3626_v57 }
 0x248   : > { %v2320_v2 = vsel %vm1897_vm2, nan, %v2319_v44  ;;  %v2027_v7 = vshrl.u32 %v4422_v17, %v2026_v43  ;;  %vm2043_vm1 = vcmp.lt.s32.totalorder %v2024_v29, 1  ;;  %v2052_v9 = vsel %vm2046_vm0, %v2039_v52, 920167782 }
 0x249   : > { %v2641_v5 = vadd.f32 1.0, %v2637_v33  ;;  %v4060_v3 = vpop.eup %4059  ;;  %vm2045_vm4 = vcmp.lt.s32.totalorder %v2024_v29, 3  ;;  %v2048_v10 = vsel %vm2046_vm0, %v2036_v46, 2102212464  ;;  %v2051_v57 = vsel %vm2043_vm1, %v2030_v45, %v2033_v39 }
 0x24a   : > { %v4062_v16 = vpop.eup %4061  ;;  %v2007_v4 = vxor.u32 2147483648, %v4060_v3  ;;  %v2053_v21 = vsel %vm2045_vm4, %v2036_v46, %v2052_v9  ;;  %v2055_v55 = vsel %vm2043_vm1, %v2033_v39, %v2036_v46  ;;  %v2661_v43 = vmul.f32 %v5075_v27, %v1907_v28 }
 0x24b   : > { %v2649_v18 = vadd.f32 %v5100_v0, %v2641_v5  ;;  %v2004_v12 = vxor.u32 2147483648, %v4062_v16  ;;  %vm2044_vm2 = vcmp.lt.s32.totalorder %v2024_v29, 2  ;;  %v2056_v0 = vsel %vm2046_vm0, %v2042_v1, 1326507024 }
 0x24c   : > { %v2008_v23 = vsel %vm2006_vm10, %v2007_v4, %v4062_v16  ;;  %v2047_v41 = vsel %vm2043_vm1, %v2027_v7, %v2030_v45  ;;  %v2049_v24 = vsel %vm2045_vm4, %v2033_v39, %v2048_v10  ;;  %v2057_v58 = vsel %vm2045_vm4, %v2039_v52, %v2056_v0 }
 0x24d   : > { %v2005_v13 = vsel %vm2003_vm11, %v4060_v3, %v2004_v12  ;;  %4063 = vrcp.f32 %v2649_v18  ;;  %v2054_v33 = vsel %vm2044_vm2, %v2051_v57, %v2053_v21  ;;  %v2058_v36 = vsel %vm2044_vm2, %v2055_v55, %v2057_v58 }
 0x24e   : > { %v2009_v32 = vsel %vm2002_vm12, %v2005_v13, %v2008_v23  ;;  %v2669_v40 = vadd.f32 %v5075_v27, %v1907_v28  ;;  %v5172_v44 = vmul.u32.u64.low %v5145_v63, %v2058_v36  ;;  %v5173_v46 = vmul.u32.u64.high %v5145_v63, %v2058_v36, %v5172_v44 }
 0x24f   : > { %v2010_v62 = vsel %vm2000_vm13, nan, %v2009_v32  ;;  %vm2657_vm5 = vcmp.ge.f32.partialorder %v4936_v50, 0.0  ;;  %v2419_v52 = vsel %vm2417_vm14, %v4060_v3, %v2004_v12  ;;  %v2422_v38 = vsel %vm2420_vm15, %v2007_v4, %v4062_v16 }
 0x250   : > { %v2638_v54 = vmul.f32 %v5107_v53, %v2010_v62  ;;  %v2050_v5 = vsel %vm2044_vm2, %v2047_v41, %v2049_v24  ;;  %v5183_v28 = vmul.u32.u64.low %v5145_v63, %v2054_v33  ;;  %v5184_v45 = vmul.u32.u64.high %v5145_v63, %v2054_v33, %v5183_v28 }
 0x251   : > { %vm2125_vm6 = vcmp.gt.s32.totalorder %v2124_v60, 0  ;;  %v5187_v39 = vshll.u32 %v2122_v48, 8  ;;  %v2665_v1 = vadd.f32 1.0, %v2661_v43  ;;  %v2685_v7 = vmul.f32 %v5075_v27, %v2320_v2 }
 0x252   : > { %v2642_v9 = vadd.f32 1.0, %v2638_v54  ;;  %v2126_v3 = vsel %vm2125_vm6, %v2124_v60, 0  ;;  %v2673_v18 = vmul.f32 %v5075_v27, %v2669_v40  ;;  %v2423_v53 = vsel %vm2416_vm3, %v2419_v52, %v2422_v38 }
 0x253   : > { %v2066_v29 = vmul.u32 %v5145_v63, %v2050_v5  ;;  %v2128_v16 = vand.u32 31, %v2126_v3  ;;  %v2662_v10 = vmul.f32 %v5083_v56, %v2010_v62  ;;  %v2670_v48 = vadd.f32 %v5083_v56, %v2010_v62  ;;  %v5223_v5 = vld [vmem:[%s5059_s25 + $0x10] sm:$0xff]  ;;  %s3684_s25 = smul.u32 384, %s4648_s16 }
 0x254   : > { %v2650_v4 = vadd.f32 %v5114_v49, %v2642_v9  ;;  %vm2068_vm7 = vc.u32 %v5173_v46, %v5183_v28  ;;  %v2069_v2 = vadd.s32 1, %v5184_v45  ;;  %v2127_v60 = vshrl.u32 %v2126_v3, 5  ;;  %v2693_v3 = vld [vmem:[%s441_s21] sm:$0xff] }
 0x255   : > { %v2129_v12 = vsub.s32 32, %v2128_v16  ;;  %v2131_v27 = vshll.u32 %v4422_v17, %v2128_v16  ;;  %v2134_v6 = vshll.u32 %v4423_v19, %v2128_v16  ;;  %v2137_v63 = vshll.u32 %v4424_v20, %v2128_v16 }
 0x256   : > { %4065 = vrcp.f32 %v2650_v4  ;;  %v2140_v49 = vshll.u32 %v4425_v22, %v2128_v16  ;;  %v2070_v57 = vsel %vm2068_vm7, %v2069_v2, %v5184_v45  ;;  %v2143_v43 = vshll.u32 %v4426_v26, %v2128_v16 }
 0x257   : > { %v2132_v21 = vshrl.u32 %v4423_v19, %v2129_v12  ;;  %v2135_v55 = vshrl.u32 %v4424_v20, %v2129_v12  ;;  %v2071_v23 = vadd.s32 %v2070_v57, %v2066_v29  ;;  %v2138_v0 = vshrl.u32 %v4425_v22, %v2129_v12 }
 0x258   : > { %v2141_v13 = vshrl.u32 %v4426_v26, %v2129_v12  ;;  %v2144_v41 = vshrl.u32 %v4427_v30, %v2129_v12  ;;  %vm2658_vm8 = vcmp.ge.f32.partialorder %v4938_v51, 0.0  ;;  %v2677_v24 = vsel %vm2657_vm5, %v2665_v1, %v2673_v18  ;;  %v2695_v18 = vld [vmem:[%s450_s24] sm:$0xff] }
 0x259   : > { %v2424_v58 = vsel %vm2000_vm13, nan, %v2423_v53  ;;  %v2133_v19 = vor.u32 %v2132_v21, %v2131_v27  ;;  %v2136_v32 = vor.u32 %v2135_v55, %v2134_v6  ;;  %v2072_v20 = vadd.s32 536870912, %v2071_v23  ;;  %v5254_v21 = vld [vmem:[%s468_s19] sm:$0xff]  ;;  %v5256_v55 = vld [vmem:[%s468_s19 + $0x8] sm:$0xff] }
 0x25a   : > { %v2139_v33 = vor.u32 %v2138_v0, %v2137_v63  ;;  %v2142_v36 = vor.u32 %v2141_v13, %v2140_v49  ;;  %v2145_v40 = vor.u32 %v2144_v41, %v2143_v43  ;;  %v4064_v22 = vpop.eup %4063  ;;  %v2666_v62 = vadd.f32 1.0, %v2662_v10  ;;  %v5258_v43 = vld [vmem:[%s468_s19 + $0x10] sm:$0xff]  ;;  %s4249_s19 = scalar_lea.vmem %s5533_s29, 256 }
 0x25b   : > { %v2674_v26 = vmul.f32 %v5083_v56, %v2670_v48  ;;  %v2130_v30 = vshrl.u32 %v4422_v17, %v2129_v12  ;;  %vm2149_vm9 = vcmp.lt.s32.totalorder %v2127_v60, 4  ;;  %v5218_v50 = vshrl.u32 %v2072_v20, 30  ;;  %p4250_p5 = scmp.ne.s32.totalorder %s5533_s29, %s4249_s19 }
 0x25c   : > { %vm2146_vm10 = vcmp.lt.s32.totalorder %v2127_v60, 1  ;;  %vm2148_vm11 = vcmp.lt.s32.totalorder %v2127_v60, 3  ;;  %v2151_v59 = vsel %vm2149_vm9, %v2139_v33, 2102212464  ;;  %v2155_v52 = vsel %vm2149_vm9, %v2142_v36, 920167782 }
 0x25d   : > { %v2154_v44 = vsel %vm2146_vm10, %v2133_v19, %v2136_v32  ;;  %v2158_v38 = vsel %vm2146_vm10, %v2136_v32, %v2139_v33  ;;  %v2159_v54 = vsel %vm2149_vm9, %v2145_v40, 1326507024  ;;  %v5225_v45 = vmul.f32 %v4064_v22, %v2677_v24  ;;  %p4251_p2 = pnand %p4250_p5, %p5798_p8 }
 0x25e   : > { %v5227_v1 = vmul.f32 %v4064_v22, %v2685_v7  ;;  %v2074_v17 = vshll.u32 %v5218_v50, 30  ;;  %v2156_v9 = vsel %vm2148_vm11, %v2139_v33, %v2155_v52  ;;  %vm2147_vm12 = vcmp.lt.s32.totalorder %v2127_v60, 2 }
 0x25f   : > { %v2150_v53 = vsel %vm2146_vm10, %v2130_v30, %v2133_v19  ;;  %v2152_v29 = vsel %vm2148_vm11, %v2136_v32, %v2151_v59  ;;  %v2160_v16 = vsel %vm2148_vm11, %v2142_v36, %v2159_v54  ;;  %v2157_v7 = vsel %vm2147_vm12, %v2154_v44, %v2156_v9  ;;  %p4252_p3 = pneg %p4251_p2 }
 0x260   : > { %v5239_v4 = vsub.s32 %v2071_v23, %v2074_v17  ;;  %v2161_v10 = vsel %vm2147_vm12, %v2158_v38, %v2160_v16  ;;  %v5243_v48 = vrot.slane %v5223_v5, %v5048_v8  ;;  %v2699_v27 = vcombine.high %v2693_v3, %v2693_v3 }
 0x261   : > { %v5246_v2 = vmul.u32.u64.low %v5187_v39, %v2161_v10  ;;  %v5247_v12 = vmul.u32.u64.high %v5187_v39, %v2161_v10, %v5246_v2  ;;  %v2709_v6 = vcombine.high %v2695_v18, %v2695_v18  ;;  %v2678_v63 = vsel %vm2658_vm8, %v2666_v62, %v2674_v26 }
 0x262   : > { %v2686_v60 = vmul.f32 %v5083_v56, %v2424_v58  ;;  %v2077_v49 = vsub.s32 0, %v5239_v4  ;;  %v2153_v57 = vsel %vm2147_vm12, %v2150_v53, %v2152_v29  ;;  %v2731_v51 = vmul.f32 %v2695_v18, %v5225_v45 }
 0x263   : > { %v4066_v23 = vpop.eup %4065  ;;  %v5261_v0 = vmul.u32.u64.low %v5187_v39, %v2157_v7  ;;  %v5262_v13 = vmul.u32.u64.high %v5187_v39, %v2157_v7, %v5261_v0  ;;  %v2735_v56 = vmul.f32 %v2693_v3, %v5227_v1  ;;  %v5274_v19 = vcombine.low %v5095_v42, %v5095_v42 }
 0x264   : > { %v5267_v41 = vmul.f32 %v4066_v23, %v2678_v63  ;;  %v5269_v24 = vmul.f32 %v4066_v23, %v2686_v60  ;;  %v3623_v58 = vmin.u32 %v2077_v49, %v5239_v4  ;;  %v2169_v32 = vmul.u32 %v5187_v39, %v2153_v57 }
 0x265   : > { %v5279_v20 = vrot.slane %v5254_v21, %v5048_v8  ;;  %v5283_v33 = vrot.slane %v5256_v55, %v5048_v8  ;;  %v5287_v36 = vrot.slane %v5258_v43, %v5048_v8  ;;  %vm2171_vm13 = vc.u32 %v5247_v12, %v5261_v0 }
 0x266   : > { %v2079_v40 = vclz %v3623_v58  ;;  %v2732_v22 = vmul.f32 %v2709_v6, %v5267_v41  ;;  %v2736_v39 = vmul.f32 %v2699_v27, %v5269_v24  ;;  %v2172_v62 = vadd.s32 1, %v5262_v13 }
 0x267   : > { %v2739_v26 = vadd.f32 %v2735_v56, %v2731_v51  ;;  %v2703_v30 = vmul.f32 %v2693_v3, %v5225_v45  ;;  %v2713_v59 = vmul.f32 %v2695_v18, %v5227_v1  ;;  %v2704_v38 = vmul.f32 %v2699_v27, %v5267_v41 }
 0x268   : > { %v3624_v44 = vadd.s32 4294967294, %v2079_v40  ;;  %v2740_v52 = vadd.f32 %v2736_v39, %v2732_v22  ;;  %v2714_v54 = vmul.f32 %v2709_v6, %v5269_v24  ;;  %v1791_v17 = vand.u32 2147483647, %v5032_v47 }
 0x269   : > { %v2173_v9 = vsel %vm2171_vm13, %v2172_v62, %v5262_v13  ;;  %v5302_v53 = vcombine.low %v5243_v48, %v5243_v48  ;;  %v5306_v3 = vcombine.low %v5279_v20, %v5279_v20  ;;  %v2717_v10 = vsub.f32 %v2703_v30, %v2713_v59 }
 0x26a   : > { %vm3625_vm14 = vcmp.lt.s32.totalorder %v3624_v44, 0  ;;  %v2174_v18 = vadd.s32 %v2173_v9, %v2169_v32  ;;  %v2747_v29 = vcombine.low %v2739_v26, %v2740_v52  ;;  %v2718_v16 = vsub.f32 %v2704_v38, %v2714_v54 }
 0x26b   : > { %v2082_v7 = vsel %vm3625_vm14, 0, %v3624_v44  ;;  %v2872_v2 = vcombine.low %v5283_v33, %v5283_v33  ;;  %v5312_v27 = vcombine.low %v5287_v36, %v5287_v36  ;;  %v2067_v6 = vadd.s32 %v5183_v28, %v5173_v46 }
 0x26c   : > { %v2083_v63 = vsub.s32 32, %v2082_v7  ;;  %v2087_v60 = vsub.s32 4294967266, %v2082_v7  ;;  %v2175_v49 = vadd.s32 536870912, %v2174_v18  ;;  %2751 = vst [vmem:[%s5317_s26] sm:$0xff] %v2747_v29  ;;  %v1795_v57 = vsub.f32 0.0, %v1791_v17 }
 0x26d   : > { %v2725_v23 = vcombine.low %v2717_v10, %v2718_v16  ;;  %v2825_v13 = vmul.f32 %v5090_v35, %v5225_v45  ;;  %v2826_v51 = vmul.f32 %v5070_v14, %v5267_v41  ;;  %v2084_v56 = vshll.u32 %v5239_v4, %v2082_v7 }
 0x26e   : > { %v2085_v58 = vshrl.u32 %v2067_v6, %v2083_v63  ;;  %v2088_v32 = vadd.s32 127, %v2087_v60  ;;  %v5325_v46 = vshrl.u32 %v2175_v49, 30  ;;  %v2829_v28 = vmul.f32 %v5274_v19, %v5225_v45 }
 0x26f   : > { %2729 = vst [vmem:[%s5328_s2] sm:$0xff] %v2725_v23  ;;  %v2830_v40 = vmul.f32 %v5095_v42, %v5267_v41  ;;  %v2903_v22 = vmul.f32 %v5306_v3, %v5227_v1  ;;  %v2904_v4 = vmul.f32 %v5279_v20, %v5269_v24  ;;  %v2833_v30 = vmul.f32 %v5302_v53, %v5225_v45 }
 0x270   : > { %v2086_v39 = vor.u32 %v2085_v58, %v2084_v56  ;;  %v2089_v62 = vshll.u32 %v2088_v32, 23  ;;  %v2177_v26 = vshll.u32 %v5325_v46, 30  ;;  %v2834_v59 = vmul.f32 %v5243_v48, %v5267_v41 }
 0x271   : > { %v2907_v44 = vmul.f32 %v2872_v2, %v5227_v1  ;;  %v2908_v52 = vmul.f32 %v5283_v33, %v5269_v24  ;;  %v2911_v38 = vmul.f32 %v5312_v27, %v5227_v1  ;;  %v2912_v9 = vmul.f32 %v5287_v36, %v5269_v24 }
 0x272   : > { %v2090_v54 = vor.u32 4788187, %v2089_v62  ;;  %v2178_v17 = vsub.s32 %v2174_v18, %v2177_v26  ;;  %v2915_v29 = vsub.f32 %v2825_v13, %v2903_v22  ;;  %v2916_v16 = vsub.f32 %v2826_v51, %v2904_v4 }
 0x273   : > { %v1801_v7 = vmul.f32 1.442695, %v1795_v57  ;;  %v2093_v6 = vcvt.s32.f32 %v2086_v39  ;;  %v2919_v60 = vsub.f32 %v2829_v28, %v2907_v44  ;;  %v2920_v49 = vsub.f32 %v2830_v40, %v2908_v52 }
 0x274   : > { %v2091_v10 = vand.u32 2147483647, %v2090_v54  ;;  %v2180_v63 = vsub.s32 0, %v2178_v17  ;;  %v2923_v23 = vsub.f32 %v2833_v30, %v2911_v38  ;;  %v2924_v56 = vsub.f32 %v2834_v59, %v2912_v9 }
 0x275   : > { %v5351_v61 = vcombine.high %v2915_v29, %v2916_v16  ;;  %v5353_v34 = vcombine.high %v2919_v60, %v2920_v49  ;;  %4067 = vpow2.f32 %v1801_v7  ;;  %v5792_v57 = vand.u32 2147483647, %v5053_v11 }
 0x276   : > { %v2094_v58 = vmul.f32 %v2093_v6, %v2091_v10  ;;  %v3627_v32 = vmin.u32 %v2180_v63, %v2178_v17  ;;  %v5355_v26 = vcombine.high %v2923_v23, %v2924_v56  ;;  %vm2013_vm0 = vcmp.lt.s32.totalorder %v5053_v11, 0 }
 0x277   : > { %vm5359_vm15 = vcmp.le.f32.partialorder %v5792_v57, 0.7853982  ;;  %v2097_v51 = vsub.s32 4, %v5218_v50  ;;  %v2170_v40 = vadd.s32 %v5261_v0, %v5247_v12  ;;  %v2996_v4 = vmul.f32 %v5306_v3, %v5225_v45 }
 0x278   : > { %v2095_v18 = vxor.u32 2147483648, %v2094_v58  ;;  %v2182_v62 = vclz %v3627_v32  ;;  %v2997_v30 = vmul.f32 %v5279_v20, %v5267_v41  ;;  %v3000_v59 = vmul.f32 %v2872_v2, %v5225_v45 }
 0x279   : > { %v3001_v44 = vmul.f32 %v5283_v33, %v5267_v41  ;;  %v3004_v12 = vmul.f32 %v5312_v27, %v5225_v45  ;;  %v3005_v0 = vmul.f32 %v5287_v36, %v5267_v41  ;;  %v3008_v52 = vmul.f32 %v5090_v35, %v5227_v1 }
 0x27a   : > { %v2096_v28 = vsel %vm2013_vm0, %v2095_v18, %v2094_v58  ;;  %v3628_v22 = vadd.s32 4294967294, %v2182_v62  ;;  %v3009_v20 = vmul.f32 %v5070_v14, %v5269_v24  ;;  %v3012_v33 = vmul.f32 %v5274_v19, %v5227_v1 }
 0x27b   : > { %v2099_v39 = vsel %vm5359_vm15, %v5053_v11, %v2096_v28  ;;  %v3013_v45 = vmul.f32 %v5095_v42, %v5269_v24  ;;  %v3016_v41 = vmul.f32 %v5302_v53, %v5227_v1  ;;  %v3017_v36 = vmul.f32 %v5243_v48, %v5269_v24 }
 0x27c   : > { %4069 = vcosq.f32 %v2099_v39  ;;  %vm3629_vm1 = vcmp.lt.s32.totalorder %v3628_v22, 0  ;;  %v5395_v27 = vadd.f32 %v3008_v52, %v2996_v4  ;;  %v5397_v14 = vadd.f32 %v3009_v20, %v2997_v30 }
 0x27d   : > { %4071 = vsinq.f32 %v2099_v39  ;;  %v2185_v3 = vsel %vm3629_vm1, 0, %v3628_v22  ;;  %v2098_v19 = vsel %vm2013_vm0, %v2097_v51, %v5218_v50  ;;  %v5404_v29 = vadd.f32 %v3013_v45, %v3001_v44 }
 0x27e   : > { %v2186_v2 = vsub.s32 32, %v2185_v3  ;;  %v2187_v38 = vshll.u32 %v2178_v17, %v2185_v3  ;;  %v2190_v54 = vsub.s32 4294967266, %v2185_v3  ;;  %v5399_v17 = vadd.f32 %v3012_v33, %v3000_v59 }
 0x27f   : > { %v5406_v42 = vadd.f32 %v3016_v41, %v3004_v12  ;;  %v5408_v1 = vadd.f32 %v3017_v36, %v3005_v0  ;;  %v3044_v24 = vcombine.high %v5395_v27, %v5397_v14  ;;  %v1792_v16 = vand.u32 2147483647, %v5038_v37 }
 0x280   : > { %v2188_v35 = vshrl.u32 %v2170_v40, %v2186_v2  ;;  %v2191_v9 = vadd.s32 127, %v2190_v54  ;;  %v3061_v7 = vcombine.high %v5399_v17, %v5404_v29  ;;  %v2100_v50 = vsel %vm5359_vm15, 0, %v2098_v19 }
 0x281   : > { %v3078_v10 = vcombine.high %v5406_v42, %v5408_v1  ;;  %v1796_v23 = vsub.f32 0.0, %v1792_v16  ;;  %v2104_v56 = vand.u32 3, %v2100_v50  ;;  %vm2116_vm4 = vcmp.lt.s32.totalorder %v5073_v25, 0 }
 0x282   : > { %v2189_v53 = vor.u32 %v2188_v35, %v2187_v38  ;;  %v2192_v48 = vshll.u32 %v2191_v9, 23  ;;  %v5419_v63 = vpop.eup %4067  ;;  %v5795_v40 = vand.u32 2147483647, %v5073_v25  ;;  %vm2103_vm7 = vweird.f32 %v5053_v11 }
 0x283   : > { %v1803_v51 = vmul.f32 1.442695, %v1796_v23  ;;  %vm2109_vm3 = vcmp.eq.s32.totalorder %v2104_v56, 2  ;;  %vm2106_vm2 = vcmp.eq.s32.totalorder %v2104_v56, 0  ;;  %vm2105_vm6 = vcmp.lt.s32.totalorder %v2104_v56, 2 }
 0x284   : > { %v2193_v6 = vor.u32 4788187, %v2192_v48  ;;  %v2196_v49 = vcvt.s32.f32 %v2189_v53  ;;  %vm5424_vm5 = vcmp.le.f32.partialorder %v5795_v40, 0.7853982  ;;  %v2635_v44 = vmul.f32 2.0, %v5419_v63 }
 0x285   : > { %v2200_v0 = vsub.s32 4, %v5325_v46  ;;  %v2647_v2 = vmul.f32 %v5419_v63, %v5419_v63  ;;  %v2518_v54 = vadd.s32 3, %v2100_v50  ;;  %vm2206_vm10 = vweird.f32 %v5073_v25 }
 0x286   : > { %v2194_v60 = vand.u32 2147483647, %v2193_v6  ;;  %vm2659_vm1 = vcmp.ge.f32.partialorder %v5032_v47, 0.0 }
 0x287   : > { %v2201_v52 = vsel %vm2116_vm4, %v2200_v0, %v5325_v46  ;;  %v2519_v35 = vand.u32 3, %v2518_v54 }
 0x288   : > { %v2197_v58 = vmul.f32 %v2196_v49, %v2194_v60  ;;  %v2203_v38 = vsel %vm5424_vm5, 0, %v2201_v52 }
 0x289   : > { %v4070_v32 = vpop.eup %4069  ;;  %v2207_v45 = vand.u32 3, %v2203_v38  ;;  %v2622_v48 = vadd.s32 3, %v2203_v38  ;;  %vm2521_vm12 = vcmp.eq.s32.totalorder %v2519_v35, 0  ;;  %vm2524_vm13 = vcmp.eq.s32.totalorder %v2519_v35, 2 }
 0x28a   : > { %v4072_v18 = vpop.eup %4071  ;;  %v2110_v62 = vxor.u32 2147483648, %v4070_v32  ;;  %v2198_v57 = vxor.u32 2147483648, %v2197_v58  ;;  %vm2520_vm14 = vcmp.lt.s32.totalorder %v2519_v35, 2 }
 0x28b   : > { %v2107_v28 = vxor.u32 2147483648, %v4072_v18  ;;  %vm2212_vm8 = vcmp.eq.s32.totalorder %v2207_v45, 2  ;;  %vm2209_vm9 = vcmp.eq.s32.totalorder %v2207_v45, 0  ;;  %vm2208_vm11 = vcmp.lt.s32.totalorder %v2207_v45, 2  ;;  %v2696_v45 = vld [vmem:[%s450_s24 + $0x8] sm:$0xff]  ;;  %s5571_s24 = scalar_lea.sflag [#allocation13], %s424_s27 }
 0x28c   : > { %v2111_v13 = vsel %vm2109_vm3, %v2110_v62, %v4072_v18  ;;  %v2199_v4 = vsel %vm2116_vm4, %v2198_v57, %v2197_v58  ;;  %v2526_v49 = vsel %vm2524_vm13, %v2110_v62, %v4072_v18  ;;  %v2623_v56 = vand.u32 3, %v2622_v48 }
 0x28d   : > { %v2108_v39 = vsel %vm2106_vm2, %v4070_v32, %v2107_v28  ;;  %v2202_v30 = vsel %vm5424_vm5, %v5073_v25, %v2199_v4  ;;  %v2523_v60 = vsel %vm2521_vm12, %v4070_v32, %v2107_v28  ;;  %v2762_v4 = vcombine.high %v5062_v15, %v5062_v15 }
 0x28e   : > { %v2112_v59 = vsel %vm2105_vm6, %v2108_v39, %v2111_v13  ;;  %4073 = vcosq.f32 %v2202_v30  ;;  %v2527_v13 = vsel %vm2520_vm14, %v2523_v60, %v2526_v49  ;;  %v2779_v32 = vcombine.high %v5081_v31, %v5081_v31 }
 0x28f   : > { %v2113_v12 = vsel %vm2103_vm7, nan, %v2112_v59  ;;  %4075 = vsinq.f32 %v2202_v30  ;;  %v2796_v18 = vcombine.high %v5223_v5, %v5223_v5  ;;  %v2840_v62 = vcombine.high %v5254_v21, %v5254_v21 }
 0x290   : > { %4077 = vpow2.f32 %v1803_v51  ;;  %v2639_v3 = vmul.f32 %v2635_v44, %v2113_v12  ;;  %v2663_v57 = vmul.f32 %v5419_v63, %v2113_v12  ;;  %v2671_v51 = vadd.f32 %v5419_v63, %v2113_v12 }
 0x291   : > { %vm2625_vm15 = vcmp.eq.s32.totalorder %v2623_v56, 0  ;;  %v2857_v39 = vcombine.high %v5256_v55, %v5256_v55  ;;  %v2874_v30 = vcombine.high %v5258_v43, %v5258_v43  ;;  %v2528_v15 = vsel %vm2103_vm7, nan, %v2527_v13 }
 0x292   : > { %v2643_v20 = vadd.f32 1.0, %v2639_v3  ;;  %v2667_v59 = vadd.f32 1.0, %v2663_v57  ;;  %v2675_v31 = vmul.f32 %v5419_v63, %v2671_v51  ;;  %vm2628_vm0 = vcmp.eq.s32.totalorder %v2623_v56, 2 }
 0x293   : > { %v5472_v21 = vrot.slane %v2762_v4, %v5048_v8  ;;  %v5475_v55 = vrot.slane %v2840_v62, %v5048_v8  ;;  %v2687_v11 = vmul.f32 %v5419_v63, %v2528_v15  ;;  %vm2624_vm3 = vcmp.lt.s32.totalorder %v2623_v56, 2 }
 0x294   : > { %v2651_v33 = vadd.f32 %v2647_v2, %v2643_v20  ;;  %v5479_v43 = vrot.slane %v2779_v32, %v5048_v8  ;;  %v5482_v0 = vrot.slane %v2857_v39, %v5048_v8  ;;  %v2679_v3 = vsel %vm2659_vm1, %v2667_v59, %v2675_v31 }
 0x295   : > { %v5485_v47 = vrot.slane %v2796_v18, %v5048_v8  ;;  %v5488_v20 = vrot.slane %v2874_v30, %v5048_v8  ;;  %vm2660_vm4 = vcmp.ge.f32.partialorder %v5038_v37, 0.0  ;;  %v2710_v62 = vcombine.high %v2696_v45, %v2696_v45 }
 0x296   : > { %4079 = vrcp.f32 %v2651_v33  ;;  %v2694_v33 = vld [vmem:[%s441_s21 + $0x8] sm:$0xff]  ;;  %v2795_v35 = vcombine.low %v5479_v43, %v5479_v43  ;;  %s5547_s21 = scalar_lea.hbm %s5746_s6, %s3658_s22 }
 0x297   : > { %v2890_v48 = vcombine.low %v5488_v20, %v5488_v20  ;;  %v2700_v57 = vcombine.high %v2694_v33, %v2694_v33 }
 0x29b   : > { %v4074_v41 = vpop.eup %4073 }
 0x29c   : > { %v4076_v36 = vpop.eup %4075  ;;  %v2213_v9 = vxor.u32 2147483648, %v4074_v41 }
 0x29d   : > { %v5445_v19 = vpop.eup %4077  ;;  %v2210_v53 = vxor.u32 2147483648, %v4076_v36 }
 0x29e   : > { %v2214_v46 = vsel %vm2212_vm8, %v2213_v9, %v4076_v36  ;;  %v2636_v6 = vmul.f32 2.0, %v5445_v19  ;;  %v2648_v22 = vmul.f32 %v5445_v19, %v5445_v19  ;;  %v2630_v5 = vsel %vm2628_vm0, %v2213_v9, %v4076_v36 }
 0x29f   : > { %v2211_v16 = vsel %vm2209_vm9, %v4074_v41, %v2210_v53  ;;  %v2627_v44 = vsel %vm2625_vm15, %v4074_v41, %v2210_v53  ;;  %v2778_v41 = vcombine.low %v5472_v21, %v5472_v21  ;;  %v2856_v36 = vcombine.low %v5475_v55, %v5475_v55 }
 0x2a0   : > { %v2215_v50 = vsel %vm2208_vm11, %v2211_v16, %v2214_v46  ;;  %v2631_v52 = vsel %vm2624_vm3, %v2627_v44, %v2630_v5  ;;  %v2873_v9 = vcombine.low %v5482_v0, %v5482_v0  ;;  %v2812_v46 = vcombine.low %v5485_v47, %v5485_v47 }
 0x2a1   : > { %v2216_v23 = vsel %vm2206_vm10, nan, %v2215_v50  ;;  %v2632_v53 = vsel %vm2206_vm10, nan, %v2631_v52 }
 0x2a2   : > { %v2640_v58 = vmul.f32 %v2636_v6, %v2216_v23  ;;  %v2664_v54 = vmul.f32 %v5445_v19, %v2216_v23  ;;  %v2672_v63 = vadd.f32 %v5445_v19, %v2216_v23  ;;  %v2688_v18 = vmul.f32 %v5445_v19, %v2632_v53 }
 0x2a3   : > { %v4080_v12 = vpop.eup %4079 }
 0x2a4   : > { %v2644_v40 = vadd.f32 1.0, %v2640_v58  ;;  %v2683_v2 = vmul.f32 %v4080_v12, %v2679_v3  ;;  %v2691_v38 = vmul.f32 %v4080_v12, %v2687_v11  ;;  %v2668_v16 = vadd.f32 1.0, %v2664_v54 }
 0x2a5   : > { %v2676_v50 = vmul.f32 %v5445_v19, %v2672_v63 }
 0x2a6   : > { %v2652_v28 = vadd.f32 %v2648_v22, %v2644_v40  ;;  %v2733_v6 = vmul.f32 %v2696_v45, %v2683_v2  ;;  %v2737_v60 = vmul.f32 %v2694_v33, %v2691_v38  ;;  %v2705_v49 = vmul.f32 %v2694_v33, %v2683_v2 }
 0x2a7   : > { %v2715_v23 = vmul.f32 %v2696_v45, %v2691_v38  ;;  %v2827_v56 = vmul.f32 %v2778_v41, %v2683_v2  ;;  %v2905_v58 = vmul.f32 %v2856_v36, %v2691_v38  ;;  %v2831_v25 = vmul.f32 %v2795_v35, %v2683_v2 }
 0x2a8   : > { %4081 = vrcp.f32 %v2652_v28  ;;  %v2909_v51 = vmul.f32 %v2873_v9, %v2691_v38  ;;  %v2835_v13 = vmul.f32 %v2812_v46, %v2683_v2  ;;  %v2913_v40 = vmul.f32 %v2890_v48, %v2691_v38 }
 0x2a9   : > { %v2998_v22 = vmul.f32 %v2856_v36, %v2683_v2  ;;  %v3010_v4 = vmul.f32 %v2778_v41, %v2691_v38  ;;  %v2680_v32 = vsel %vm2660_vm4, %v2668_v16, %v2676_v50  ;;  %v2947_v28 = vrot.slane %v5351_v61, %v5048_v8 }
 0x2aa   : > { %v2741_v30 = vadd.f32 %v2737_v60, %v2733_v6  ;;  %v2719_v15 = vsub.f32 %v2705_v49, %v2715_v23  ;;  %v2917_v37 = vsub.f32 %v2827_v56, %v2905_v58  ;;  %v3002_v59 = vmul.f32 %v2873_v9, %v2683_v2 }
 0x2ab   : > { %v2921_v5 = vsub.f32 %v2831_v25, %v2909_v51  ;;  %v3006_v12 = vmul.f32 %v2890_v48, %v2683_v2  ;;  %v2925_v11 = vsub.f32 %v2835_v13, %v2913_v40  ;;  %v3014_v3 = vmul.f32 %v2795_v35, %v2691_v38 }
 0x2ac   : > { %v3018_v19 = vmul.f32 %v2812_v46, %v2691_v38  ;;  %v5516_v52 = vadd.f32 %v3010_v4, %v2998_v22 }
 0x2ad   : > { %v5565_v51 = vadd.f32 %v3014_v3, %v3002_v59 }
 0x2ae   : > { %v5567_v13 = vadd.f32 %v3018_v19, %v3006_v12 }
 0x2b5   : > { %v4082_v39 = vpop.eup %4081 }
 0x2b6   : > { %v2684_v31 = vmul.f32 %v4082_v39, %v2680_v32  ;;  %v2692_v44 = vmul.f32 %v4082_v39, %v2688_v18 }
 0x2b8   : > { %v2734_v54 = vmul.f32 %v2710_v62, %v2684_v31  ;;  %v2738_v63 = vmul.f32 %v2700_v57, %v2692_v44  ;;  %v2706_v33 = vmul.f32 %v2700_v57, %v2684_v31  ;;  %v2716_v45 = vmul.f32 %v2710_v62, %v2692_v44 }
 0x2b9   : > { %v2828_v41 = vmul.f32 %v5472_v21, %v2684_v31  ;;  %v2832_v36 = vmul.f32 %v5479_v43, %v2684_v31  ;;  %v2836_v2 = vmul.f32 %v5485_v47, %v2684_v31  ;;  %v2906_v9 = vmul.f32 %v5475_v55, %v2692_v44 }
 0x2ba   : > { %v2742_v53 = vadd.f32 %v2738_v63, %v2734_v54  ;;  %v2720_v38 = vsub.f32 %v2706_v33, %v2716_v45  ;;  %v2910_v35 = vmul.f32 %v5482_v0, %v2692_v44  ;;  %v2914_v46 = vmul.f32 %v5488_v20, %v2692_v44 }
 0x2bb   : > { %v2918_v48 = vsub.f32 %v2828_v41, %v2906_v9  ;;  %v2999_v16 = vmul.f32 %v5475_v55, %v2684_v31  ;;  %v3003_v50 = vmul.f32 %v5482_v0, %v2684_v31  ;;  %v3007_v6 = vmul.f32 %v5488_v20, %v2684_v31 }
 0x2bc   : > { %v2748_v60 = vcombine.low %v2741_v30, %v2742_v53  ;;  %v2726_v49 = vcombine.low %v2719_v15, %v2720_v38  ;;  %v2922_v23 = vsub.f32 %v2832_v36, %v2910_v35  ;;  %v2926_v56 = vsub.f32 %v2836_v2, %v2914_v46 }
 0x2bd   : > { %v5551_v55 = vcombine.high %v2917_v37, %v2918_v48  ;;  %v3011_v0 = vmul.f32 %v5472_v21, %v2692_v44  ;;  %v3015_v20 = vmul.f32 %v5479_v43, %v2692_v44  ;;  %v3019_v58 = vmul.f32 %v5485_v47, %v2692_v44 }
 0x2be   : > { %2752 = vst [vmem:[%s5317_s26 + $0x8] sm:$0xff] %v2748_v60  ;;  %2730 = vst [vmem:[%s5328_s2 + $0x8] sm:$0xff] %v2726_v49  ;;  %v5559_v57 = vcombine.high %v2921_v5, %v2922_v23  ;;  %v5561_v25 = vcombine.high %v2925_v11, %v2926_v56  ;;  %s4429_s26 = smov [#allocation12]  }
 0x2bf   : > { %s4253_s2 = sshll.u32 %s4429_s26, 4  ;;  %s4254_s2 = int_to_ptr.vmem [resolvable:$false] %s4253_s2 }
 0x2c0   : > { %s4255_s22 = scalar_lea.vmem %s4254_s2, 512  ;;  %p4256_p10 = scmp.lt.s32.totalorder %s5533_s29, %s4254_s2 }
 0x2c1   : > { %p4257_p9 = scmp.lt.s32.totalorder %s4255_s22, %s4249_s19 }
 0x2c3   : > { %p4258_p7 = por %p4257_p9, %p4256_p10 }
 0x2c5   : > { %p4259_p12 = pnand %p4258_p7, %p4252_p3 }
 0x2c7   : > { %4262 = shalt.err (!%p4259_p12)
}
 0x2c8   : > { %s4263_s27 = scalar_lea.hbm %s5528_s20, 256  ;;  %s4267_s18 = scalar_lea.hbm %s5747_s7, 512 }
 0x2c9   : > { %p4264_p1 = scmp.ne.s32.totalorder %s5528_s20, %s4263_s27  ;;  %p4268_p11 = scmp.lt.s32.totalorder %s5528_s20, %s5747_s7 }
 0x2ca   : > { %p4269_p13 = scmp.lt.s32.totalorder %s4267_s18, %s4263_s27 }
 0x2cb   : > { %p4265_p0 = pnand %p4264_p1, %p5798_p8 }
 0x2cc   : > { %p4270_p4 = por %p4269_p13, %p4268_p11 }
 0x2cd   : > { %p4266_p6 = pneg %p4265_p0 }
 0x2cf   : > { %p4271_p5 = pnand %p4270_p4, %p4266_p6 }
 0x2d1   : > { %4274 = shalt.err (!%p4271_p5)
}
 0x2d2   : > { %3701 = dma.vmem_to_hbm [thread:$0]  (%p5798_p8), %s5533_s29, 256, %s5528_s20, %s5571_s24   ;;  %v2954_v21 = vrot.slane %v5551_v55, %v5048_v8  ;;  %v3023_v43 = vadd.f32 %v3011_v0, %v2999_v16  ;;  %v3027_v47 = vadd.f32 %v3015_v20, %v3003_v50  ;;  %v3031_v40 = vadd.f32 %v3019_v58, %v3007_v6 }
 0x2d3   : > { %s3102_s19 = scalar_lea.sflag [#allocation4], %s4735_s17  ;;  %s4275_s2 = scalar_lea.vmem %s5549_s9, 256 }
 0x2d4   : > { %p4276_p2 = scmp.ne.s32.totalorder %s5549_s9, %s4275_s2  ;;  %s4430_s22 = smov [#allocation11]  }
 0x2d5   : > { %s4279_s27 = sshll.u32 %s4430_s22, 4  ;;  %s4280_s27 = int_to_ptr.vmem [resolvable:$false] %s4279_s27 }
 0x2d6   : > { %p4277_p3 = pnand %p4276_p2, %p5798_p8  ;;  %s4281_s3 = scalar_lea.vmem %s4280_s27, 512 }
 0x2d7   : > { %p4282_p9 = scmp.lt.s32.totalorder %s5549_s9, %s4280_s27  ;;  %p4283_p7 = scmp.lt.s32.totalorder %s4281_s3, %s4275_s2 }
 0x2d8   : > { %p4278_p10 = pneg %p4277_p3 }
 0x2d9   : > { %p4284_p12 = por %p4283_p7, %p4282_p9 }
 0x2db   : > { %p4285_p1 = pnand %p4284_p12, %p4278_p10 }
 0x2dd   : > { %4288 = shalt.err (!%p4285_p1)
}
 0x2de   : > { %s4289_s29 = scalar_lea.hbm %s5547_s21, 256  ;;  %s4293_s18 = scalar_lea.hbm %s5746_s6, 512 }
 0x2df   : > { %p4290_p0 = scmp.ne.s32.totalorder %s5547_s21, %s4289_s29  ;;  %p4294_p13 = scmp.lt.s32.totalorder %s5547_s21, %s5746_s6 }
 0x2e0   : > { %p4295_p4 = scmp.lt.s32.totalorder %s4293_s18, %s4289_s29 }
 0x2e1   : > { %p4291_p6 = pnand %p4290_p0, %p5798_p8 }
 0x2e2   : > { %p4296_p5 = por %p4295_p4, %p4294_p13 }
 0x2e3   : > { %p4292_p11 = pneg %p4291_p6 }
 0x2e5   : > { %p4297_p2 = pnand %p4296_p5, %p4292_p11 }
 0x2e7   : > { %4300 = shalt.err (!%p4297_p2)
}
 0x2e8   : > { %3700 = dma.vmem_to_hbm [thread:$0]  (%p5798_p8), %s5549_s9, 256, %s5547_s21, %s3102_s19   ;;  %v2964_v22 = vrot.slane %v5353_v34, %v5048_v8  ;;  %v2971_v4 = vrot.slane %v5559_v57, %v5048_v8  ;;  %v2981_v32 = vrot.slane %v5355_v26, %v5048_v8  ;;  %v2988_v18 = vrot.slane %v5561_v25, %v5048_v8 }
 0x2e9   : > { %v2955_v62 = vcombine.low %v2947_v28, %v2954_v21  ;;  %v3045_v39 = vcombine.high %v5516_v52, %v3023_v43  ;;  %v3062_v30 = vcombine.high %v5565_v51, %v3027_v47  ;;  %v3079_v34 = vcombine.high %v5567_v13, %v3031_v40  ;;  %s5632_s9 = scalar_lea.vmem [#allocation15], %s5030_s0  ;;  %s5640_s22 = scalar_lea.hbm %s5748_s8, %s3684_s25 }
 0x2ea   : > { %s3174_s21 = sshll.u32 %s5632_s9, 4  ;;  %v2972_v26 = vcombine.low %v2964_v22, %v2971_v4  ;;  %v2989_v15 = vcombine.low %v2981_v32, %v2988_v18  ;;  %v3052_v61 = vrot.slane %v3044_v24, %v5048_v8  ;;  %v3069_v28 = vrot.slane %v3061_v7, %v5048_v8  ;;  %s5799_s3 = sld [smem:[#allocation29_spill]]  ;;  %s5667_s21 = int_to_ptr.vmem [resolvable:$true] %s3174_s21 }
 0x2eb   : > { %2993 = vst [vmem:[%s5536_s15] sm:$0xff] %v2955_v62  ;;  %v3059_v37 = vrot.slane %v3045_v39, %v5048_v8  ;;  %v3076_v59 = vrot.slane %v3062_v30, %v5048_v8  ;;  %v3086_v31 = vrot.slane %v3078_v10, %v5048_v8  ;;  %v3093_v44 = vrot.slane %v3079_v34, %v5048_v8  ;;  %s4301_s20 = scalar_lea.vmem %s5563_s13, 384  ;;  %s4431_s4 = smov [#allocation14]  }
 0x2ec   : > { %2994 = vst [vmem:[%s5536_s15 + $0x8] sm:$0xff] %v2972_v26  ;;  %2995 = vst [vmem:[%s5536_s15 + $0x10] sm:$0xff] %v2989_v15  ;;  %p4302_p3 = scmp.ne.s32.totalorder %s5563_s13, %s4301_s20  ;;  %s4305_s18 = sshll.u32 %s4431_s4, 4  ;;  %s4306_s18 = int_to_ptr.vmem [resolvable:$false] %s4305_s18 }
 0x2ed   : > { %s4307_s14 = scalar_lea.vmem %s4306_s18, 768  ;;  %p4308_p7 = scmp.lt.s32.totalorder %s5563_s13, %s4306_s18 }
 0x2ee   : > { %p4303_p10 = pnand %p4302_p3, %p5798_p8  ;;  %p4309_p12 = scmp.lt.s32.totalorder %s4307_s14, %s4301_s20 }
 0x2f0   : > { %s5665_s29 = scalar_lea.hbm %s5799_s3, %s3684_s25  ;;  %p4304_p9 = pneg %p4303_p10 }
 0x2f1   : > { %p4310_p1 = por %p4309_p12, %p4308_p7 }
 0x2f3   : > { %p4311_p0 = pnand %p4310_p1, %p4304_p9 }
 0x2f5   : > { %4314 = shalt.err (!%p4311_p0)
}
 0x2f6   : > { %s4315_s16 = scalar_lea.hbm %s5640_s22, 384  ;;  %s4319_s26 = scalar_lea.hbm %s5748_s8, 768 }
 0x2f7   : > { %p4316_p6 = scmp.ne.s32.totalorder %s5640_s22, %s4315_s16  ;;  %p4320_p4 = scmp.lt.s32.totalorder %s5640_s22, %s5748_s8 }
 0x2f8   : > { %p4321_p5 = scmp.lt.s32.totalorder %s4319_s26, %s4315_s16 }
 0x2f9   : > { %p4317_p11 = pnand %p4316_p6, %p5798_p8 }
 0x2fa   : > { %p4322_p2 = por %p4321_p5, %p4320_p4 }
 0x2fb   : > { %p4318_p13 = pneg %p4317_p11 }
 0x2fd   : > { %p4323_p3 = pnand %p4322_p2, %p4318_p13 }
 0x2ff   : > { %4326 = shalt.err (!%p4323_p3)
}
 0x300   : > { %s4432_s0 = smov 128   ;;  %s4433_s27 = smov 8   ;;  %v3060_v8 = vcombine.low %v3052_v61, %v3059_v37  ;;  %v3077_v27 = vcombine.low %v3069_v28, %v3076_v59  ;;  %v3094_v14 = vcombine.low %v3086_v31, %v3093_v44 }
 0x301   : > { %3702 = dma.vmem_to_hbm [thread:$0]  (%p5798_p8), %s5563_s13, 384, %s5640_s22, %s5571_s24, %s4432_s0, %s4432_s0, %s4433_s27  }
 0x302   : > { %3098 = vst [vmem:[%s5632_s9] sm:$0xff] %v3060_v8  ;;  %3099 = vst [vmem:[%s5632_s9 + $0x8] sm:$0xff] %v3077_v27  ;;  %s3117_s20 = scalar_lea.sflag [#allocation16], %s4735_s17  ;;  %s4327_s4 = scalar_lea.vmem %s5667_s21, 384 }
 0x303   : > { %3100 = vst [vmem:[%s5632_s9 + $0x10] sm:$0xff] %v3094_v14  ;;  %p4328_p10 = scmp.ne.s32.totalorder %s5667_s21, %s4327_s4  ;;  %s4434_s18 = smov [#allocation15]  }
 0x304   : > { %s4331_s14 = sshll.u32 %s4434_s18, 4  ;;  %s4332_s14 = int_to_ptr.vmem [resolvable:$false] %s4331_s14 }
 0x305   : > { %p4329_p9 = pnand %p4328_p10, %p5798_p8  ;;  %s4333_s16 = scalar_lea.vmem %s4332_s14, 768 }
 0x306   : > { %p4334_p12 = scmp.lt.s32.totalorder %s5667_s21, %s4332_s14  ;;  %p4335_p1 = scmp.lt.s32.totalorder %s4333_s16, %s4327_s4 }
 0x307   : > { %p4330_p7 = pneg %p4329_p9 }
 0x308   : > { %p4336_p0 = por %p4335_p1, %p4334_p12 }
 0x30a   : > { %p4337_p6 = pnand %p4336_p0, %p4330_p7 }
 0x30c   : > { %4340 = shalt.err (!%p4337_p6)
}
 0x30d   : > { %s4341_s13 = scalar_lea.hbm %s5665_s29, 384  ;;  %s4345_s9 = scalar_lea.hbm %s5799_s3, 768 }
 0x30e   : > { %p4342_p11 = scmp.ne.s32.totalorder %s5665_s29, %s4341_s13  ;;  %p4346_p5 = scmp.lt.s32.totalorder %s5665_s29, %s5799_s3 }
 0x30f   : > { %p4347_p2 = scmp.lt.s32.totalorder %s4345_s9, %s4341_s13 }
 0x310   : > { %p4343_p13 = pnand %p4342_p11, %p5798_p8 }
 0x311   : > { %p4348_p3 = por %p4347_p2, %p4346_p5 }
 0x312   : > { %p4344_p4 = pneg %p4343_p13 }
 0x314   : > { %p4349_p10 = pnand %p4348_p3, %p4344_p4 }
 0x316   : > { %4352 = shalt.err (!%p4349_p10)
}
 0x317   : > { %3703 = dma.vmem_to_hbm [thread:$0]  (%p5798_p8), %s5667_s21, 384, %s5665_s29, %s3117_s20, %s4432_s0, %s4432_s0, %s4433_s27  }
 0x318 PF: > { %s3189_s25 = sand.u32 1, %s4395_s30   ;;  %p5800_p9 = scmp.ne.s32.totalorder %s5780_s23, 0 }
 0x319   : > { %p5801_p7 = scmp.ge.s32.totalorder %s4407_s12, 2  ;;  %s3190_s26 = scalar_lea.sflag [#allocation4], %s3189_s25 }
 0x31b   : > { %p3729_p12 = pnand %p5801_p7, %p5800_p9 }
 0x31d   : > { %p3730_p1 = pneg %p3729_p12 }
 0x31f   : > { %4382 = dma.done.wait (%p3730_p1), %s3190_s26, 256  }
 0x320   : > { %4384 = vsyncadd (%p3730_p1), %s3190_s26, 4294967040  ;;  %s5802_s28 = sadd.s32 4294967294, %s4407_s12  }
 0x321   : > { %s3198_s19 = sand.u32 1, %s5802_s28  }
 0x322   : > { %s3199_s2 = scalar_lea.sflag [#allocation13], %s3198_s19 }
 0x323   : > { %4386 = dma.done.wait (%p3730_p1), %s3199_s2, 640  }
 0x324   : > { %4388 = vsyncadd (%p3730_p1), %s3199_s2, 4294966656  ;;  %s3217_s4 = scalar_lea.sflag [#allocation16], %s3189_s25 }
 0x325   : > { %4390 = dma.done.wait (%p3730_p1), %s3217_s4, 384  }
 0x326   : > { %4392 = vsyncadd (%p3730_p1), %s3217_s4, 4294966912  ;;  %s5803_s12 = sld [smem:[#allocation23_spill]]  ;;  %s5805_s30 = smov %s4399_s10 }
 0x327   : > { %s5804_s21 = sld [smem:[#allocation24_spill]]  ;;  %s5806_s10 = smov %s4403_s11 }
 0x32c   : > { %p30_p8 = scmp.ge.s32.totalorder %s5803_s12, 4  }
 0x32d   : > { %s5807_s11 = smov %s5804_s21 }
 0x32e   :  { %32 = sbr.rel (!%p30_p8) target bundleno = 16 (0x10), region = 186 }
 0x333   :  { %3222 = vsyncpa [#allocation3], 1 }
 0x334   :  { %3224 = vsyncpa [#allocation3 + $0x1], 1 }
 0x335   :  { %3225 = vsyncpa [#allocation6], 1 }
 0x336   :  { %3226 = vsyncpa [#allocation4], 1 }
 0x337   :  { %3228 = vsyncpa [#allocation4 + $0x1], 1 }
 0x338   :  { %3229 = vsyncpa [#allocation13], 1 }
 0x339   :  { %3231 = vsyncpa [#allocation13 + $0x1], 1 }
 0x33a   :  { %3232 = vsyncpa [#allocation16], 1 }
 0x33b   :  { %3234 = vsyncpa [#allocation16 + $0x1], 1 }

</bundles_post_ra>
